<compile_context>
chip_gen: v5e
topology: v5e:2x2
jax: 0.10.0
libtpu: 0.0.40
codegen_flags: <defaults>
</compile_context>

<pallas_src>
import jax
import jax.numpy as jnp
from jax import lax
from jax.experimental import pallas as pl
from jax.experimental.pallas import tpu as pltpu
import numpy as np


def make_kernel(W: int, HW: int, Nb: int, residual: bool, compute_dtype):
    NbHW = Nb * HW
    # (tap index t = (ki)*3+(kj), lane shift) for the 8 non-center taps
    taps = []
    for di in (-1, 0, 1):
        for dj in (-1, 0, 1):
            t = (di + 1) * 3 + (dj + 1)
            if t == 4:
                continue
            taps.append((t, (-(di * W + dj)) % NbHW))

    def kernel(x_ref, w1_ref, wdwb_ref, b2e_ref, w3_ref, b3_ref, o_ref):
        cd = compute_dtype

        # --- conv1 (1x1 expand, BN scale folded): one MXU dot over all Nb images
        h = jnp.dot(w1_ref[...], x_ref[...].astype(cd),
                    preferred_element_type=jnp.float32).astype(cd)      # (Cexp, NbHW)

        # --- depthwise 3x3 (pad=1): lane rolls (XLU) + MAC with a running
        #     accumulator; border masks & lane broadcasts are pre-folded into
        #     wdwb_ref, so there is no jnp.where / broadcast materialization here.
        acc = wdwb_ref[4] * h                                           # center tap
        for t, shift in taps:
            acc = acc + wdwb_ref[t] * pltpu.roll(h, shift, 1)

        # bias (conv1-bias pass-through folded into b2_eff) + ReLU6, kept in f32
        a = jnp.clip(acc.astype(jnp.float32) + b2e_ref[...], 0.0, 6.0)

        # --- conv3 (1x1 project, BN scale folded) + bias: one MXU dot
        y = jnp.dot(w3_ref[...], a.astype(cd),
                    preferred_element_type=jnp.float32) + b3_ref[...]   # (Cout, NbHW)

        if residual:
            y = y + x_ref[...]                     # skip connection in f32

        o_ref[...] = y.astype(o_ref.dtype)         # lane-dense store (NbHW % 128 == 0)

    return kernel


def inverted_residual_pallas(x_nchw, w1f, b1, wdwf, b2, w3f, b3, *, stride=1,
                             compute_dtype=jnp.float32):
    """x_nchw: (N, Cin, H, W) f32.  BN-folded weights:
       w1f (Cexp, Cin), wdwf (Cexp, 9) [t = ki*3+kj], w3f (Cout, Cexp); biases (C,)."""
    N, Cin, H, W = x_nchw.shape
    Cexp = w1f.shape[0]
    Cout = w3f.shape[0]
    if stride != 1:
        # TODO(synk): stride-aware depthwise taps not implemented.
        raise NotImplementedError("only stride=1 blocks are implemented")
    HW = H * W
    residual = (Cin == Cout)

    # Images per grid step: keep the lane slab small (bounded vreg working set)
    # while keeping >= 2 grid steps so the batch axis can still be split.
    Nb = 2 if (N % 2 == 0 and N >= 4) else 1
    NbHW = Nb * HW
    assert NbHW % 128 == 0, "lane slab must be a multiple of 128"
    assert N % Nb == 0

    # ------- grid-invariant constants, precomputed once in the wrapper -------
    # within-image row/col index of every lane position of the Nb-image slab
    pos = np.arange(NbHW)
    q = pos % HW
    ii = q // W
    jj = q % W
    masks = np.empty((9, NbHW), np.float32)       # tap validity (zero padding)
    for di in (-1, 0, 1):
        for dj in (-1, 0, 1):
            t = (di + 1) * 3 + (dj + 1)
            ok = np.ones(NbHW, bool)
            if di == -1:
                ok &= ii >= 1
            if di == 1:
                ok &= ii <= H - 2
            if dj == -1:
                ok &= jj >= 1
            if dj == 1:
                ok &= jj <= W - 2
            masks[t] = ok
    masks_j = jnp.asarray(masks)                                         # (9, NbHW)

    # per-tap depthwise weights, pre-broadcast over lanes with the border mask
    # folded in -> the kernel needs no where / broadcast materialization
    wdw_bcast = (wdwf.T[:, :, None] * masks_j[:, None, :]).astype(compute_dtype)  # (9,Cexp,NbHW)
    # conv1 bias folded through the depthwise taps into a per-position bias
    b2_eff = (b2[:, None] + b1[:, None] * (wdwf @ masks_j)).astype(jnp.float32)   # (Cexp,NbHW)

    # channels-on-sublane / (batch*spatial)-on-lane layout (one-time wrapper restack)
    x_cn = jnp.transpose(x_nchw.reshape(N, Cin, HW), (1, 0, 2)).reshape(Cin, N * HW)

    out_cn = pl.pallas_call(
        make_kernel(W, HW, Nb, residual, compute_dtype),
        out_shape=jax.ShapeDtypeStruct((Cout, N * HW), x_nchw.dtype),
        grid_spec=pltpu.PrefetchScalarGridSpec(
            num_scalar_prefetch=0,
            grid=(N // Nb,),
            in_specs=[
                pl.BlockSpec((Cin, NbHW), lambda n: (0, n)),
                pl.BlockSpec((Cexp, Cin), lambda n: (0, 0)),
                pl.BlockSpec((9, Cexp, NbHW), lambda n: (0, 0, 0)),
                pl.BlockSpec((Cexp, NbHW), lambda n: (0, 0)),
                pl.BlockSpec((Cout, Cexp), lambda n: (0, 0)),
                pl.BlockSpec((Cout, 1), lambda n: (0, 0)),
            ],
            out_specs=pl.BlockSpec((Cout, NbHW), lambda n: (0, n)),
        ),
        # TODO(synk): on v7x use CORE_PARALLEL here to engage both TensorCores.
        compiler_params=pltpu.CompilerParams(dimension_semantics=("parallel",)),
    )(x_cn,
      w1f.astype(compute_dtype),
      wdw_bcast,
      b2_eff,
      w3f.astype(compute_dtype),
      b3.reshape(Cout, 1).astype(jnp.float32))

    return jnp.transpose(out_cn.reshape(Cout, N, HW), (1, 0, 2)).reshape(N, Cout, H, W)


# ----------------------------- reference (pure JAX) ---------------------------
def ref_forward(x_nchw, w1f, b1, wdwf, b2, w3f, b3, stride, residual):
    Cexp = w1f.shape[0]
    Cout = w3f.shape[0]
    x = jnp.transpose(x_nchw, (0, 2, 3, 1))                           # NHWC
    h = jnp.einsum('nhwc,ec->nhwe', x, w1f) + b1.reshape(1, 1, 1, Cexp)
    wdw_hwio = wdwf.reshape(Cexp, 3, 3).transpose(1, 2, 0)[:, :, None, :]
    h = lax.conv_general_dilated(
        h, wdw_hwio, window_strides=(stride, stride), padding=((1, 1), (1, 1)),
        dimension_numbers=('NHWC', 'HWIO', 'NHWC'), feature_group_count=Cexp)
    h = h + b2.reshape(1, 1, 1, Cexp)
    h = jnp.clip(h, 0.0, 6.0)
    y = jnp.einsum('nhwe,oe->nhwo', h, w3f) + b3.reshape(1, 1, 1, Cout)
    if residual:
        y = y + x
    return jnp.transpose(y, (0, 3, 1, 2))                             # back to NCHW


# ----------------------------- parameter setup (deterministic) ----------------
def bn_params(key, c):
    k1, k2, k3, k4 = jax.random.split(key, 4)
    gamma = jax.random.uniform(k1, (c,), jnp.float32, 0.5, 1.5)
    beta = jax.random.normal(k2, (c,), jnp.float32) * 0.1
    mean = jax.random.normal(k3, (c,), jnp.float32) * 0.1
    var = jax.random.uniform(k4, (c,), jnp.float32, 0.5, 1.5)
    return gamma, beta, mean, var


def fold_bn(conv_bias, gamma, beta, mean, var, eps=1e-5):
    scale = gamma / jnp.sqrt(var + eps)
    bias = (conv_bias - mean) * scale + beta
    return scale, bias


if __name__ == "__main__":
    # bf16 elementwise/matmul compute only on bf16-native VPU/MXU generations
    # (v6e / v7x); f32 on v5e and older (no bf16 VALU there).
    dk = jax.devices()[0].device_kind.lower()
    use_bf16 = any(s in dk for s in ("v6", "v7", "tpu7"))
    compute_dtype = jnp.bfloat16 if use_bf16 else jnp.float32

    key = jax.random.PRNGKey(0)
    # batch=4 so each grid step carries 2 images and the grid still has 2 steps.
    N, Cin, H, W = 4, 4, 16, 16
    expansion, Cout, stride = 6, 4, 1            # Cin==Cout, stride==1 -> residual path
    Cexp = Cin * expansion

    ks = jax.random.split(key, 10)
    x_nchw = jax.random.normal(ks[0], (N, Cin, H, W), jnp.float32)

    # conv weights in PyTorch shapes
    w1_t = jax.random.normal(ks[1], (Cexp, Cin, 1, 1), jnp.float32) * 0.1    # conv1
    b1_t = jax.random.normal(ks[2], (Cexp,), jnp.float32) * 0.1
    wdw_t = jax.random.normal(ks[3], (Cexp, 1, 3, 3), jnp.float32) * 0.1     # depthwise
    bdw_t = jax.random.normal(ks[4], (Cexp,), jnp.float32) * 0.1
    w3_t = jax.random.normal(ks[5], (Cout, Cexp, 1, 1), jnp.float32) * 0.1   # conv3
    b3_t = jax.random.normal(ks[6], (Cout,), jnp.float32) * 0.1

    g1, be1, m1, v1 = bn_params(ks[7], Cexp)     # bn1
    g2, be2, m2, v2 = bn_params(ks[8], Cexp)     # bn2
    g3, be3, m3, v3 = bn_params(ks[9], Cout)     # bn3

    # fold conv bias + BN into per-channel scale/bias, then fold the scales into
    # the conv weights (one-time wrapper math) so the kernel only adds biases.
    s1, b1 = fold_bn(b1_t, g1, be1, m1, v1)
    s2, b2 = fold_bn(bdw_t, g2, be2, m2, v2)
    s3, b3 = fold_bn(b3_t, g3, be3, m3, v3)

    w1f = w1_t[:, :, 0, 0] * s1[:, None]                     # (Cexp, Cin)
    wdwf = wdw_t[:, 0].reshape(Cexp, 9) * s2[:, None]        # (Cexp, 9), t = ki*3+kj
    w3f = w3_t[:, :, 0, 0] * s3[:, None]                     # (Cout, Cexp)

    out = inverted_residual_pallas(x_nchw, w1f, b1, wdwf, b2, w3f, b3,
                                   stride=stride, compute_dtype=compute_dtype)
    out = jax.block_until_ready(out)

    residual = (stride == 1 and Cin == Cout)
    ref = ref_forward(x_nchw, w1f, b1, wdwf, b2, w3f, b3, stride, residual)
    tol = 5e-2 if use_bf16 else 1e-3             # looser when the bf16 path is active
    np.testing.assert_allclose(np.asarray(out), np.asarray(ref), rtol=tol, atol=tol)

    assert out.shape == (N, Cout, H, W)
    print("KERNEL_OK")
</pallas_src>

<mosaic_0001>
module attributes {stable_mosaic.version = 11 : i64} {
  func.func @kernel(%arg0: i32, %arg1: memref<4x512xf32, #tpu.memory_space<vmem>>, %arg2: memref<24x4xf32, #tpu.memory_space<vmem>>, %arg3: memref<9x24x512xf32, #tpu.memory_space<vmem>>, %arg4: memref<24x512xf32, #tpu.memory_space<vmem>>, %arg5: memref<4x24xf32, #tpu.memory_space<vmem>>, %arg6: memref<4x1xf32, #tpu.memory_space<vmem>>, %arg7: memref<4x512xf32, #tpu.memory_space<vmem>>) attributes {dimension_semantics = [#tpu.dimension_semantics<parallel>], iteration_bounds = array<i64: 2>, scalar_prefetch = 0 : i64, scratch_operands = 0 : i64, tpu.core_type = #tpu.core_type<tc>, window_params = [{transform_indices = @transform_0, window_bounds = array<i64: 4, 512>}, {pipeline_mode = #tpu.pipeline_mode<synchronous>, transform_indices = @transform_1, window_bounds = array<i64: 24, 4>}, {pipeline_mode = #tpu.pipeline_mode<synchronous>, transform_indices = @transform_2, window_bounds = array<i64: 9, 24, 512>}, {pipeline_mode = #tpu.pipeline_mode<synchronous>, transform_indices = @transform_3, window_bounds = array<i64: 24, 512>}, {pipeline_mode = #tpu.pipeline_mode<synchronous>, transform_indices = @transform_4, window_bounds = array<i64: 4, 24>}, {pipeline_mode = #tpu.pipeline_mode<synchronous>, transform_indices = @transform_5, window_bounds = array<i64: 4, 1>}, {transform_indices = @transform_6, window_bounds = array<i64: 4, 512>}]} {
    %c0 = arith.constant 0 : index
    %c0_0 = arith.constant 0 : index
    %0 = vector.load %arg2[%c0, %c0_0] : memref<24x4xf32, #tpu.memory_space<vmem>>, vector<24x4xf32>
    %c0_1 = arith.constant 0 : index
    %c0_2 = arith.constant 0 : index
    %1 = vector.load %arg1[%c0_1, %c0_2] : memref<4x512xf32, #tpu.memory_space<vmem>>, vector<4x512xf32>
    %cst = arith.constant dense<0.000000e+00> : vector<24x512xf32>
    %2 = tpu.matmul %0, %1, %cst {dimension_numbers = #tpu.dot_dimension_numbers<[1], [0], [0], [1], [0, 0, 1, 1], [], []>} : vector<24x4xf32>, vector<4x512xf32>, vector<24x512xf32> -> vector<24x512xf32>
    %c4 = arith.constant 4 : index
    %c0_3 = arith.constant 0 : index
    %c0_4 = arith.constant 0 : index
    %3 = vector.load %arg3[%c4, %c0_3, %c0_4] : memref<9x24x512xf32, #tpu.memory_space<vmem>>, vector<1x24x512xf32>
    %4 = vector.shape_cast %3 : vector<1x24x512xf32> to vector<24x512xf32>
    %5 = arith.mulf %4, %2 : vector<24x512xf32>
    %c0_5 = arith.constant 0 : index
    %c0_6 = arith.constant 0 : index
    %c0_7 = arith.constant 0 : index
    %6 = vector.load %arg3[%c0_5, %c0_6, %c0_7] : memref<9x24x512xf32, #tpu.memory_space<vmem>>, vector<1x24x512xf32>
    %7 = vector.shape_cast %6 : vector<1x24x512xf32> to vector<24x512xf32>
    %c17_i32 = arith.constant 17 : i32
    %8 = tpu.dynamic_rotate %2 by %c17_i32 dim 1 : vector<24x512xf32>, i32 -> vector<24x512xf32>
    %9 = arith.mulf %7, %8 : vector<24x512xf32>
    %10 = arith.addf %5, %9 : vector<24x512xf32>
    %c1 = arith.constant 1 : index
    %c0_8 = arith.constant 0 : index
    %c0_9 = arith.constant 0 : index
    %11 = vector.load %arg3[%c1, %c0_8, %c0_9] : memref<9x24x512xf32, #tpu.memory_space<vmem>>, vector<1x24x512xf32>
    %12 = vector.shape_cast %11 : vector<1x24x512xf32> to vector<24x512xf32>
    %c16_i32 = arith.constant 16 : i32
    %13 = tpu.dynamic_rotate %2 by %c16_i32 dim 1 : vector<24x512xf32>, i32 -> vector<24x512xf32>
    %14 = arith.mulf %12, %13 : vector<24x512xf32>
    %15 = arith.addf %10, %14 : vector<24x512xf32>
    %c2 = arith.constant 2 : index
    %c0_10 = arith.constant 0 : index
    %c0_11 = arith.constant 0 : index
    %16 = vector.load %arg3[%c2, %c0_10, %c0_11] : memref<9x24x512xf32, #tpu.memory_space<vmem>>, vector<1x24x512xf32>
    %17 = vector.shape_cast %16 : vector<1x24x512xf32> to vector<24x512xf32>
    %c15_i32 = arith.constant 15 : i32
    %18 = tpu.dynamic_rotate %2 by %c15_i32 dim 1 : vector<24x512xf32>, i32 -> vector<24x512xf32>
    %19 = arith.mulf %17, %18 : vector<24x512xf32>
    %20 = arith.addf %15, %19 : vector<24x512xf32>
    %c3 = arith.constant 3 : index
    %c0_12 = arith.constant 0 : index
    %c0_13 = arith.constant 0 : index
    %21 = vector.load %arg3[%c3, %c0_12, %c0_13] : memref<9x24x512xf32, #tpu.memory_space<vmem>>, vector<1x24x512xf32>
    %22 = vector.shape_cast %21 : vector<1x24x512xf32> to vector<24x512xf32>
    %c1_i32 = arith.constant 1 : i32
    %23 = tpu.dynamic_rotate %2 by %c1_i32 dim 1 : vector<24x512xf32>, i32 -> vector<24x512xf32>
    %24 = arith.mulf %22, %23 : vector<24x512xf32>
    %25 = arith.addf %20, %24 : vector<24x512xf32>
    %c5 = arith.constant 5 : index
    %c0_14 = arith.constant 0 : index
    %c0_15 = arith.constant 0 : index
    %26 = vector.load %arg3[%c5, %c0_14, %c0_15] : memref<9x24x512xf32, #tpu.memory_space<vmem>>, vector<1x24x512xf32>
    %27 = vector.shape_cast %26 : vector<1x24x512xf32> to vector<24x512xf32>
    %c511_i32 = arith.constant 511 : i32
    %28 = tpu.dynamic_rotate %2 by %c511_i32 dim 1 : vector<24x512xf32>, i32 -> vector<24x512xf32>
    %29 = arith.mulf %27, %28 : vector<24x512xf32>
    %30 = arith.addf %25, %29 : vector<24x512xf32>
    %c6 = arith.constant 6 : index
    %c0_16 = arith.constant 0 : index
    %c0_17 = arith.constant 0 : index
    %31 = vector.load %arg3[%c6, %c0_16, %c0_17] : memref<9x24x512xf32, #tpu.memory_space<vmem>>, vector<1x24x512xf32>
    %32 = vector.shape_cast %31 : vector<1x24x512xf32> to vector<24x512xf32>
    %c497_i32 = arith.constant 497 : i32
    %33 = tpu.dynamic_rotate %2 by %c497_i32 dim 1 : vector<24x512xf32>, i32 -> vector<24x512xf32>
    %34 = arith.mulf %32, %33 : vector<24x512xf32>
    %35 = arith.addf %30, %34 : vector<24x512xf32>
    %c7 = arith.constant 7 : index
    %c0_18 = arith.constant 0 : index
    %c0_19 = arith.constant 0 : index
    %36 = vector.load %arg3[%c7, %c0_18, %c0_19] : memref<9x24x512xf32, #tpu.memory_space<vmem>>, vector<1x24x512xf32>
    %37 = vector.shape_cast %36 : vector<1x24x512xf32> to vector<24x512xf32>
    %c496_i32 = arith.constant 496 : i32
    %38 = tpu.dynamic_rotate %2 by %c496_i32 dim 1 : vector<24x512xf32>, i32 -> vector<24x512xf32>
    %39 = arith.mulf %37, %38 : vector<24x512xf32>
    %40 = arith.addf %35, %39 : vector<24x512xf32>
    %c8 = arith.constant 8 : index
    %c0_20 = arith.constant 0 : index
    %c0_21 = arith.constant 0 : index
    %41 = vector.load %arg3[%c8, %c0_20, %c0_21] : memref<9x24x512xf32, #tpu.memory_space<vmem>>, vector<1x24x512xf32>
    %42 = vector.shape_cast %41 : vector<1x24x512xf32> to vector<24x512xf32>
    %c495_i32 = arith.constant 495 : i32
    %43 = tpu.dynamic_rotate %2 by %c495_i32 dim 1 : vector<24x512xf32>, i32 -> vector<24x512xf32>
    %44 = arith.mulf %42, %43 : vector<24x512xf32>
    %45 = arith.addf %40, %44 : vector<24x512xf32>
    %c0_22 = arith.constant 0 : index
    %c0_23 = arith.constant 0 : index
    %46 = vector.load %arg4[%c0_22, %c0_23] : memref<24x512xf32, #tpu.memory_space<vmem>>, vector<24x512xf32>
    %47 = arith.addf %45, %46 : vector<24x512xf32>
    %cst_24 = arith.constant 0.000000e+00 : f32
    %cst_25 = arith.constant 6.000000e+00 : f32
    %48 = vector.broadcast %cst_24 : f32 to vector<24x512xf32>
    %49 = arith.maximumf %48, %47 : vector<24x512xf32>
    %50 = vector.broadcast %cst_25 : f32 to vector<24x512xf32>
    %51 = arith.minimumf %50, %49 : vector<24x512xf32>
    %c0_26 = arith.constant 0 : index
    %c0_27 = arith.constant 0 : index
    %52 = vector.load %arg5[%c0_26, %c0_27] : memref<4x24xf32, #tpu.memory_space<vmem>>, vector<4x24xf32>
    %cst_28 = arith.constant dense<0.000000e+00> : vector<4x512xf32>
    %53 = tpu.matmul %52, %51, %cst_28 {dimension_numbers = #tpu.dot_dimension_numbers<[1], [0], [0], [1], [0, 0, 1, 1], [], []>} : vector<4x24xf32>, vector<24x512xf32>, vector<4x512xf32> -> vector<4x512xf32>
    %c0_29 = arith.constant 0 : index
    %c0_30 = arith.constant 0 : index
    %54 = vector.load %arg6[%c0_29, %c0_30] : memref<4x1xf32, #tpu.memory_space<vmem>>, vector<4x1xf32>
    %55 = vector.broadcast %54 : vector<4x1xf32> to vector<4x512xf32>
    %56 = arith.addf %53, %55 : vector<4x512xf32>
    %c0_31 = arith.constant 0 : index
    %c0_32 = arith.constant 0 : index
    %57 = vector.load %arg1[%c0_31, %c0_32] : memref<4x512xf32, #tpu.memory_space<vmem>>, vector<4x512xf32>
    %58 = arith.addf %56, %57 : vector<4x512xf32>
    %c0_33 = arith.constant 0 : index
    %c0_34 = arith.constant 0 : index
    %59 = vector.load %arg7[%c0_33, %c0_34] : memref<4x512xf32, #tpu.memory_space<vmem>>, vector<4x512xf32>
    tpu.vector_store %arg7[%c0_33, %c0_34], %58 {strides = array<i32>} : memref<4x512xf32, #tpu.memory_space<vmem>>, vector<4x512xf32>,
    return
  }
  func.func @transform_0(%arg0: i32) -> (i32, i32) {
    %c0_i32 = arith.constant 0 : i32
    %c0_i32_0 = arith.constant 0 : i32
    return %c0_i32, %arg0 : i32, i32
  }
  func.func @transform_1(%arg0: i32) -> (i32, i32) {
    %c0_i32 = arith.constant 0 : i32
    %c0_i32_0 = arith.constant 0 : i32
    %c0_i32_1 = arith.constant 0 : i32
    return %c0_i32, %c0_i32_0 : i32, i32
  }
  func.func @transform_2(%arg0: i32) -> (i32, i32, i32) {
    %c0_i32 = arith.constant 0 : i32
    %c0_i32_0 = arith.constant 0 : i32
    %c0_i32_1 = arith.constant 0 : i32
    %c0_i32_2 = arith.constant 0 : i32
    return %c0_i32, %c0_i32_0, %c0_i32_1 : i32, i32, i32
  }
  func.func @transform_3(%arg0: i32) -> (i32, i32) {
    %c0_i32 = arith.constant 0 : i32
    %c0_i32_0 = arith.constant 0 : i32
    %c0_i32_1 = arith.constant 0 : i32
    return %c0_i32, %c0_i32_0 : i32, i32
  }
  func.func @transform_4(%arg0: i32) -> (i32, i32) {
    %c0_i32 = arith.constant 0 : i32
    %c0_i32_0 = arith.constant 0 : i32
    %c0_i32_1 = arith.constant 0 : i32
    return %c0_i32, %c0_i32_0 : i32, i32
  }
  func.func @transform_5(%arg0: i32) -> (i32, i32) {
    %c0_i32 = arith.constant 0 : i32
    %c0_i32_0 = arith.constant 0 : i32
    %c0_i32_1 = arith.constant 0 : i32
    return %c0_i32, %c0_i32_0 : i32, i32
  }
  func.func @transform_6(%arg0: i32) -> (i32, i32) {
    %c0_i32 = arith.constant 0 : i32
    %c0_i32_0 = arith.constant 0 : i32
    return %c0_i32, %arg0 : i32, i32
  }
}

</mosaic_0001>

<bundles_post_ra>
// kernel: tpu_custom_call.1
= control target key start
LH: loop header
LB: loop body
LE: loop exit
PB: predicated region body
PF: predicated region fallthrough
CT: control target
= control target key end

     0   :  { %s2565_s0 = inlined_call_operand.hbm [shape: f32[4,1024], index: 0, kind: input, shape index: {}]   ;;  %s2566_s1 = inlined_call_operand.vmem [shape: f32[24,4], index: 1, kind: input, shape index: {}]   ;;  %s2567_s2 = inlined_call_operand.hbm [shape: f32[9,24,512], index: 2, kind: input, shape index: {}]   ;;  %s2568_s3 = inlined_call_operand.hbm [shape: f32[24,512], index: 3, kind: input, shape index: {}]   ;;  %s2569_s4 = inlined_call_operand.vmem [shape: f32[4,24], index: 4, kind: input, shape index: {}]   ;;  %s2570_s5 = inlined_call_operand.vmem [shape: f32[4,1], index: 5, kind: input, shape index: {}]   ;;  %s2571_s6 = inlined_call_operand.hbm [shape: f32[4,1024], index: 6, kind: output, shape index: {}]  }
   0x1   :  { %2574 = sst [smem:[#allocation18_spill]] %s2567_s2 }
   0x2   :  { %11 = vsyncpa [#allocation3], 0 }
   0x3   :  { %13 = vsyncpa [#allocation3 + $0x1], 0 }
   0x4   :  { %14 = vsyncpa [#allocation6], 0 }
   0x5   :  { %15 = vsyncpa [#allocation4], 0 }
   0x6   :  { %17 = vsyncpa [#allocation4 + $0x1], 0  ;;  %s1661_s21 = smov 0   ;;  %s1663_s22 = smov 0  }
   0x7   :  { %s1665_s23 = smov 0   ;;  %s1667_s24 = smov 0  }
   0x8 LB: > { %s2575_s2 = sld [smem:[#allocation18_spill]]  ;;  %s1685_s28 = sadd.s32 4294967295, %s1611_s24   ;;  %s1611_s24 = sphi %s1667_s24, %s2598_s24   ;;  %s1607_s23 = sphi %s1665_s23, %s2597_s23   ;;  %s1603_s22 = sphi %s1663_s22, %s2596_s22   ;;  %s1599_s21 = sphi %s1661_s21, %s2595_s21  }
   0x9   : > { %p1333_p0 = scmp.ge.s32.totalorder %s1611_s24, 1  ;;  %p44_p1 = scmp.eq.s32.totalorder %s1685_s28, 0 }
   0xa   : > { %p185_p2 = scmp.lt.s32.totalorder %s1611_s24, 3  ;;  %s1613_s30 = smov [#allocation5]  }
   0xb   : > { %s201_s7 = sshll.u32 %s1613_s30, 4  ;;  %s213_s10 = sshll.u32 %s2568_s3, 4  ;;  %s202_s7 = int_to_ptr.vmem [resolvable:$true] %s201_s7  ;;  %s214_s10 = int_to_ptr.hbm [resolvable:$true] %s213_s10 }
   0xc   : > { %p1690_p3 = pnand %p1333_p0, %p185_p2  ;;  %s1614_s11 = smov [#allocation7]  }
   0xd   : > { %s215_s12 = sshll.u32 %s1614_s11, 4  ;;  %s1615_s13 = smov 512   ;;  %s216_s12 = int_to_ptr.vmem [resolvable:$true] %s215_s12 }
   0xe   : > { %s199_s27 = sshll.u32 %s2575_s2, 4  ;;  %p1384_p4 = pneg %p1690_p3  ;;  %s200_s27 = int_to_ptr.hbm [resolvable:$true] %s199_s27 }
   0xf   : > { %s1616_s14 = smov 32   ;;  %s1332_s15 = sadd.s32 4294967294, %s1611_s24  }
  0x10   : > { %p1385_p6 = pnand %p1384_p4, %p44_p1  ;;  %s1704_s16 = sadd.s32 1, %s1611_s24  }
  0x11   : > { %s27_s17 = ssub.s32 %s1611_s24, %s1704_s16  ;;  %s30_s18 = sadd.s32 1, %s1607_s23 }
  0x12   : > { %1387 = dma.hbm_to_vmem [thread:$0]  (!%p1385_p6), %s200_s27, 13824, %s202_s7, [#allocation6], %s1615_s13, %s1615_s13, %s1616_s14  }
  0x13   : > { %1390 = dma.hbm_to_vmem [thread:$0]  (!%p1385_p6), %s214_s10, 1536, %s216_s12, [#allocation6], %s1615_s13, %s1615_s13, %s1616_s14  }
  0x14   : > { %p28_p7 = scmp.eq.s32.totalorder %s27_s17, 0  ;;  %p37_p8 = scmp.ne.s32.totalorder %s1607_s23, %s1603_s22 }
  0x15   : > { %p38_p9 = scmp.eq.s32.totalorder %s1611_s24, 0  ;;  %p43_p10 = scmp.ne.s32.totalorder %s1603_s22, %s1599_s21 }
  0x16   : > { %s1715_s19 = scalar_select %p28_p7, %s1607_s23, %s30_s18  }
  0x17   : > { %p1717_p11 = por %p38_p9, %p37_p8  ;;  %p1723_p12 = por %p44_p1, %p43_p10 }
  0x18   : > { %p172_p13 = scmp.eq.s32.totalorder %s1685_s28, 1  ;;  %p178_p0 = scmp.eq.s32.totalorder %s1332_s15, 1 }
  0x19   : > { %p1401_p2 = scmp.lt.s32.totalorder %s1611_s24, 2  ;;  %s235_s26 = sand.u32 1, %s1607_s23  }
  0x1a   : > { %p1730_p4 = por %p172_p13, %p37_p8  ;;  %p1734_p6 = por %p178_p0, %p43_p10 }
  0x1b   : > { %s1337_s7 = sshll.u32 %s235_s26, 4  ;;  %s1370_s8 = sshll.u32 %s1611_s24, 4 }
  0x1c   : > { %s244_s11 = scalar_lea.hbm %s2565_s0, %s1370_s8  ;;  %s239_s12 = scalar_lea.vmem [#allocation2], %s1337_s7 }
  0x1d   : > { %s248_s13 = sshll.u32 %s239_s12, 4  ;;  %s246_s14 = sshll.u32 %s244_s11, 4  ;;  %s249_s13 = int_to_ptr.vmem [resolvable:$true] %s248_s13  ;;  %s247_s14 = int_to_ptr.hbm [resolvable:$true] %s246_s14 }
  0x1e   : > { %p1744_p7 = pnand %p1401_p2, %p1717_p11  ;;  %s236_s17 = scalar_lea.sflag [#allocation3], %s235_s26 }
  0x1f   : > { %s1511_s18 = sshra.s32 %s247_s14, 4  ;;  %s1518_s9 = scalar_lea.hbm %s2565_s0, 32  ;;  %s1512_s18 = int_to_ptr.hbm [resolvable:$true] %s1511_s18 }
  0x20   : > { %s1513_s2 = scalar_lea.hbm %s1512_s18, 16  ;;  %p1515_p9 = pneg %p1744_p7 }
  0x21   : > { %p1514_p8 = scmp.ne.s32.totalorder %s1512_s18, %s1513_s2  ;;  %p1519_p11 = scmp.lt.s32.totalorder %s1512_s18, %s2565_s0 }
  0x22   : > { %p1520_p0 = scmp.lt.s32.totalorder %s1518_s9, %s1513_s2 }
  0x23   : > { %p1516_p10 = pnand %p1515_p9, %p1514_p8 }
  0x24   : > { %p1521_p2 = por %p1520_p0, %p1519_p11 }
  0x25   : > { %p1517_p13 = pneg %p1516_p10 }
  0x27   : > { %p1522_p5 = pnand %p1521_p2, %p1517_p13 }
  0x29   : > { %1525 = shalt.err (!%p1522_p5)
}
  0x2a   : > { %1394 = dma.hbm_to_vmem [thread:$0]  (!%p1744_p7), %s247_s14, 256, %s249_s13, %s236_s17  }
  0x2b   : > { %257 = sbr.rel (%p1690_p3) target bundleno = 704 (0x2c0), region = 44 }
  0x30   : > { %s1761_s26 = sand.u32 1, %s1603_s22  }
  0x31   : > { %s1341_s11 = sshll.u32 %s1761_s26, 4  ;;  %s260_s12 = scalar_lea.sflag [#allocation3], %s1761_s26 }
  0x32   : > { %s263_s2 = scalar_lea.vmem [#allocation2], %s1341_s11 }
  0x33   : > { %1586 = dma.done.wait (%p1723_p12), %s260_s12, 256  }
  0x34   : > { %1588 = vsyncadd (%p1723_p12), %s260_s12, 4294967040 }
  0x35   : > { %1590 = dma.done.wait (%p44_p1), [#allocation6], 15360  }
  0x36   : > { %1592 = vsyncadd (%p44_p1), [#allocation6], 4294951936  ;;  %v308_v0 = vld [vmem:[%s263_s2] sm:$0xff]  ;;  %v309_v1 = vld [vmem:[%s263_s2 + $0x8] sm:$0xff]  ;;  %vm329_vm0 = vcmask 1043456   ;;  %vm319_vm1 = vcmask 31744   ;;  %v503_v21 = vlaneseq }
  0x37   : > { %312 = vst [vmem:[#allocation1] ss:$2 sm:$0xff] %v308_v0  ;;  %v305_v2 = vld [vmem:[%s2566_s1] sm:$0xff]  ;;  %v306_v7 = vld [vmem:[%s2566_s1 + $0x8] sm:$0xff]  ;;  %v307_v8 = vld [vmem:[%s2566_s1 + $0x10] sm:$0xff]  ;;  %s1617_s18 = smov 17  }
  0x38   : > { %314 = vst [vmem:[#allocation1 + $0x10] ss:$2 sm:$0xff] %v309_v1  ;;  %s1618_s7 = smov 127   ;;  %s1619_s8 = smov 1   ;;  %v1912_v24 = vand.u32 127, %v503_v21  ;;  %v468_v33 = vld [vmem:[#allocation5 + $0x8] sm:$0xff] }
  0x39   : > { %s1620_s9 = smov 16   ;;  %s1621_s10 = smov 15   ;;  %v444_v34 = vld [vmem:[#allocation5 + $0x188] sm:$0xff]  ;;  %vm1115_vm10 = vcmask 195584  }
  0x3a   : > { %s1622_s20 = smov 113   ;;  %s1623_s12 = smov 112   ;;  %vm505_vm2 = vcmp.lt.s32.totalorder %v1912_v24, 17  ;;  %vm579_vm3 = vcmp.lt.s32.totalorder %v1912_v24, 16  ;;  %v544_v37 = vld [vmem:[#allocation5 + $0x68] sm:$0xff]  ;;  %vm653_vm4 = vcmp.lt.s32.totalorder %v1912_v24, 15 }
  0x3b   : > { %v618_v49 = vld [vmem:[#allocation5 + $0xc8] sm:$0xff]  ;;  %s1624_s2 = smov 111   ;;  %vm727_vm5 = vcmp.lt.s32.totalorder %v1912_v24, 1  ;;  %vm801_vm6 = vcmp.lt.s32.totalorder %v1912_v24, 127  ;;  %vm875_vm7 = vcmp.lt.s32.totalorder %v1912_v24, 113  ;;  %vm949_vm8 = vcmp.lt.s32.totalorder %v1912_v24, 112 }
  0x3c   : > { %vm1023_vm9 = vcmp.lt.s32.totalorder %v1912_v24, 111  ;;  %s302_s15 = scalar_lea.vmem [#allocation8], %s1341_s11  ;;  %s1371_s17 = sshll.u32 %s1685_s28, 4 }
  0x3d   : > { %s1227_s28 = scalar_lea.sflag [#allocation4], %s1761_s26  ;;  %s1561_s29 = scalar_lea.hbm %s2571_s6, 32 }
  0x3e   : > { %v315_v3 = vld.sshfl [vmem:[#allocation1] sm:$0xff pattern:$0x75316420]  ;;  %v316_v4 = vld.sshfl [vmem:[#allocation1 + $0x8] sm:$0xff pattern:$0x75316420] }
  0x3f   : > { %1345 = vmatpush.msk.msra.mxu0 %vm329_vm0, %v315_v3  ;;  %1349 = vmatpush.msk.msra.mxu1 %vm329_vm0, %v316_v4  ;;  %1199 = vst [vmem:[#allocation1] ss:$2 sm:$0xff] %v308_v0  ;;  %v317_v5 = vld.sshfl [vmem:[#allocation1 + $0x10] sm:$0xff pattern:$0x75316420]  ;;  %v545_v4 = vld [vmem:[#allocation5 + $0x70] sm:$0xff] }
  0x40   : > { %1346 = vmatmul.msk.f32.vlgmr.msra.gmra.mxu0 %vm319_vm1, %v305_v2  ;;  %1350 = vmatmul.msk.f32.vlgmr.msra.gmra.mxu1 %vm319_vm1, %v305_v2  ;;  %v318_v6 = vld.sshfl [vmem:[#allocation1 + $0x18] sm:$0xff pattern:$0x75316420] }
  0x41   : > { %1353 = vmatpush.msk.msra.mxu2 %vm329_vm0, %v317_v5  ;;  %1357 = vmatpush.msk.msra.mxu3 %vm329_vm0, %v318_v6  ;;  %1201 = vst [vmem:[#allocation1 + $0x10] ss:$2 sm:$0xff] %v309_v1  ;;  %v469_v1 = vld [vmem:[#allocation5 + $0x10] sm:$0xff] }
  0x42   : > { %1354 = vmatmul.msk.f32.vlgmr.msra.gmra.mxu2 %vm319_vm1, %v305_v2  ;;  %1358 = vmatmul.msk.f32.vlgmr.msra.gmra.mxu3 %vm319_vm1, %v305_v2  ;;  %v445_v2 = vld [vmem:[#allocation5 + $0x190] sm:$0xff] }
  0x48   : > { %1351 = vmatmul.msk.f32.gmra.mxu1 %vm319_vm1, %v306_v7  ;;  %1347 = vmatmul.msk.f32.gmra.mxu0 %vm319_vm1, %v306_v7 }
  0x4a   : > { %1355 = vmatmul.msk.f32.gmra.mxu2 %vm319_vm1, %v306_v7  ;;  %1359 = vmatmul.msk.f32.gmra.mxu3 %vm319_vm1, %v306_v7 }
  0x50   : > { %1352 = vmatmul.msk.f32.gmra.mxu1 %vm319_vm1, %v307_v8  ;;  %1348 = vmatmul.msk.f32.gmra.mxu0 %vm319_vm1, %v307_v8 }
  0x52   : > { %1356 = vmatmul.msk.f32.gmra.mxu2 %vm319_vm1, %v307_v8  ;;  %1360 = vmatmul.msk.f32.gmra.mxu3 %vm319_vm1, %v307_v8 }
  0xbd   : > { %v1800_v9 = vpop.f32.mrf.mxu0  ;;  %v1802_v10 = vpop.f32.mrf.mxu1 }
  0xbe   : > { %485 = vrot.lane.b32.xlu1 %v1802_v10, %s1617_s18  ;;  %777 = vrot.lane.b32.xlu2 %v1800_v9, %s1618_s7  ;;  %v456_v39 = vmul.f32 %v444_v34, %v1802_v10  ;;  %v470_v34 = vld [vmem:[#allocation5 + $0x18] sm:$0xff] }
  0xbf   : > { %479 = vrot.lane.b32.xlu0 %v1800_v9, %s1617_s18 }
  0xc5   : > { %v1810_v11 = vpop.f32.mrf.mxu2  ;;  %v1818_v12 = vpop.f32.mrf.mxu1 }
  0xc6   : > { %709 = vrot.lane.b32.xlu1 %v1802_v10, %s1619_s8  ;;  %715 = vrot.lane.b32.xlu2 %v1810_v11, %s1619_s8  ;;  %v1820_v13 = vpop.f32.mrf.mxu3  ;;  %v1828_v14 = vpop.f32.mrf.mxu0  ;;  %v457_v7 = vmul.f32 %v445_v2, %v1810_v11 }
  0xc7   : > { %555 = vrot.lane.b32.xlu0 %v1800_v9, %s1620_s9 }
  0xcd   : > { %v1836_v15 = vpop.f32.mrf.mxu2  ;;  %v1844_v16 = vpop.f32.mrf.mxu1 }
  0xce   : > { %647 = vrot.lane.b32.xlu1 %v1820_v13, %s1621_s10  ;;  %487 = vrot.lane.b32.xlu2 %v1818_v12, %s1617_s18  ;;  %v1852_v17 = vpop.f32.mrf.mxu0  ;;  %v1892_v19 = vpop.f32.mrf.mxu3 }
  0xcf   : > { %561 = vrot.lane.b32.xlu0 %v1802_v10, %s1620_s9 }
  0xd5   : > { %v1910_v23 = vpop.f32.mrf.mxu2 }
  0xd6   : > { %795 = vrot.lane.b32.xlu1 %v1820_v13, %s1618_s7  ;;  %853 = vrot.lane.b32.xlu2 %v1828_v14, %s1622_s20  ;;  %v1925_v29 = vpop.f32.mrf.mxu3 }
  0xd7   : > { %629 = vrot.lane.b32.xlu0 %v1800_v9, %s1621_s10 }
  0xde   : > { %643 = vrot.lane.b32.xlu2 %v1836_v15, %s1621_s10  ;;  %557 = vrot.lane.b32.xlu1 %v1828_v14, %s1620_s9 }
  0xdf   : > { %635 = vrot.lane.b32.xlu0 %v1802_v10, %s1621_s10 }
  0xe6   : > { %489 = vrot.lane.b32.xlu2 %v1844_v16, %s1617_s18  ;;  %563 = vrot.lane.b32.xlu1 %v1818_v12, %s1620_s9 }
  0xe7   : > { %491 = vrot.lane.b32.xlu0 %v1810_v11, %s1617_s18 }
  0xee   : > { %631 = vrot.lane.b32.xlu1 %v1828_v14, %s1621_s10  ;;  %559 = vrot.lane.b32.xlu2 %v1852_v17, %s1620_s9 }
  0xef   : > { %497 = vrot.lane.b32.xlu0 %v1820_v13, %s1617_s18 }
  0xf6   : > { %637 = vrot.lane.b32.xlu1 %v1818_v12, %s1621_s10  ;;  %565 = vrot.lane.b32.xlu2 %v1844_v16, %s1620_s9 }
  0xf7   : > { %567 = vrot.lane.b32.xlu0 %v1810_v11, %s1620_s9 }
  0xfe   : > { %711 = vrot.lane.b32.xlu1 %v1818_v12, %s1619_s8  ;;  %633 = vrot.lane.b32.xlu2 %v1852_v17, %s1621_s10 }
  0xff   : > { %573 = vrot.lane.b32.xlu0 %v1820_v13, %s1620_s9 }
 0x106   : > { %779 = vrot.lane.b32.xlu1 %v1828_v14, %s1618_s7  ;;  %639 = vrot.lane.b32.xlu2 %v1844_v16, %s1621_s10 }
 0x107   : > { %641 = vrot.lane.b32.xlu0 %v1810_v11, %s1621_s10 }
 0x10e   : > { %705 = vrot.lane.b32.xlu1 %v1828_v14, %s1619_s8  ;;  %713 = vrot.lane.b32.xlu2 %v1844_v16, %s1619_s8 }
 0x10f   : > { %721 = vrot.lane.b32.xlu0 %v1820_v13, %s1619_s8 }
 0x116   : > { %493 = vrot.lane.b32.xlu1 %v1836_v15, %s1617_s18  ;;  %781 = vrot.lane.b32.xlu2 %v1852_v17, %s1618_s7 }
 0x117   : > { %481 = vrot.lane.b32.xlu0 %v1828_v14, %s1617_s18 }
 0x118   : > { %v1890_v18 = vpop.permute.xlu2 %777 }
 0x119   : > { %2582 = vst [vmem:[#allocation12_spill] sm:$0xff] %v1890_v18 }
 0x11e   : > { %499 = vrot.lane.b32.xlu1 %v1892_v19, %s1617_s18  ;;  %929 = vrot.lane.b32.xlu2 %v1852_v17, %s1623_s12 }
 0x11f   : > { %649 = vrot.lane.b32.xlu0 %v1892_v19, %s1621_s10 }
 0x120   : > { %v1900_v20 = vpop.permute.xlu2 %715 }
 0x126   : > { %569 = vrot.lane.b32.xlu1 %v1836_v15, %s1620_s9  ;;  %787 = vrot.lane.b32.xlu2 %v1844_v16, %s1618_s7 }
 0x127   : > { %717 = vrot.lane.b32.xlu0 %v1836_v15, %s1619_s8 }
 0x128   : > { %v1908_v22 = vpop.permute.xlu2 %487 }
 0x12e   : > { %575 = vrot.lane.b32.xlu1 %v1892_v19, %s1620_s9  ;;  %495 = vrot.lane.b32.xlu2 %v1910_v23, %s1617_s18 }
 0x12f   : > { %797 = vrot.lane.b32.xlu0 %v1892_v19, %s1618_s7 }
 0x130   : > { %v486_v25 = vpop.permute.xlu1 %485  ;;  %v1921_v26 = vpop.permute.xlu2 %853 }
 0x131   : > { %v480_v27 = vpop.permute.xlu0 %479 }
 0x132   : > { %v512_v28 = vsel %vm505_vm2, %v480_v27, %v486_v25 }
 0x133   : > { %v519_v35 = vmul.f32 %v512_v28, %v468_v33  ;;  %v467_v33 = vld [vmem:[#allocation5] sm:$0xff] }
 0x135   : > { %v531_v42 = vadd.f32 %v519_v35, %v456_v39  ;;  %v446_v39 = vld [vmem:[#allocation5 + $0x198] sm:$0xff] }
 0x136   : > { %723 = vrot.lane.b32.xlu1 %v1892_v19, %s1619_s8  ;;  %501 = vrot.lane.b32.xlu2 %v1925_v29, %s1617_s18 }
 0x137   : > { %791 = vrot.lane.b32.xlu0 %v1836_v15, %s1618_s7 }
 0x138   : > { %v1933_v30 = vpop.permute.xlu1 %709  ;;  %v1935_v31 = vpop.permute.xlu2 %643 }
 0x139   : > { %v1937_v32 = vpop.permute.xlu0 %555 }
 0x13e   : > { %871 = vrot.lane.b32.xlu1 %v1892_v19, %s1622_s20  ;;  %571 = vrot.lane.b32.xlu2 %v1910_v23, %s1620_s9 }
 0x13f   : > { %707 = vrot.lane.b32.xlu0 %v1852_v17, %s1619_s8 }
 0x140   : > { %v1946_v36 = vpop.permute.xlu1 %647  ;;  %v1948_v38 = vpop.permute.xlu2 %489 }
 0x141   : > { %v562_v40 = vpop.permute.xlu0 %561 }
 0x142   : > { %v586_v41 = vsel %vm579_vm3, %v1937_v32, %v562_v40 }
 0x143   : > { %v593_v43 = vmul.f32 %v586_v41, %v544_v37  ;;  %v443_v37 = vld [vmem:[#allocation5 + $0x180] sm:$0xff] }
 0x145   : > { %v605_v44 = vadd.f32 %v593_v43, %v531_v42  ;;  %v543_v43 = vld [vmem:[#allocation5 + $0x60] sm:$0xff] }
 0x146   : > { %577 = vrot.lane.b32.xlu2 %v1925_v29, %s1620_s9  ;;  %483 = vrot.lane.b32.xlu1 %v1852_v17, %s1617_s18  ;;  %s1240_s9 = sshll.u32 %s302_s15, 4  ;;  %s1241_s9 = int_to_ptr.vmem [resolvable:$true] %s1240_s9 }
 0x147   : > { %645 = vrot.lane.b32.xlu0 %v1910_v23, %s1621_s10 }
 0x148   : > { %v1961_v45 = vpop.permute.xlu1 %795  ;;  %v1963_v46 = vpop.permute.xlu2 %559 }
 0x149   : > { %2583 = vst [vmem:[#allocation13_spill] sm:$0xff] %v1961_v45  ;;  %v630_v47 = vpop.permute.xlu0 %629  ;;  %v447_v45 = vld [vmem:[#allocation5 + $0x1a0] sm:$0xff] }
 0x14a   : > { %v1968_v48 = vsel %vm653_vm4, %v1946_v36, %v630_v47 }
 0x14e   : > { %725 = vrot.lane.b32.xlu2 %v1925_v29, %s1619_s8  ;;  %855 = vrot.lane.b32.xlu1 %v1852_v17, %s1622_s20 }
 0x14f   : > { %799 = vrot.lane.b32.xlu0 %v1925_v29, %s1618_s7 }
 0x150   : > { %v1976_v50 = vpop.permute.xlu1 %557  ;;  %v1978_v51 = vpop.permute.xlu2 %565 }
 0x151   : > { %v1980_v52 = vpop.permute.xlu0 %635 }
 0x152   : > { %v660_v53 = vsel %vm653_vm4, %v630_v47, %v1980_v52 }
 0x153   : > { %v667_v54 = vmul.f32 %v660_v53, %v618_v49  ;;  %v458_v49 = vmul.f32 %v446_v39, %v1820_v13  ;;  %v455_v53 = vmul.f32 %v443_v37, %v1800_v9 }
 0x155   : > { %v1985_v55 = vadd.f32 %v667_v54, %v605_v44 }
 0x156   : > { %793 = vrot.lane.b32.xlu2 %v1910_v23, %s1618_s7  ;;  %651 = vrot.lane.b32.xlu1 %v1925_v29, %s1621_s10 }
 0x157   : > { %2584 = vst [vmem:[#allocation14_spill] sm:$0xff] %v1985_v55  ;;  %867 = vrot.lane.b32.xlu0 %v1910_v23, %s1622_s20  ;;  %v450_v55 = vld [vmem:[#allocation5 + $0x1b8] sm:$0xff] }
 0x158   : > { %v1993_v56 = vpop.permute.xlu1 %563  ;;  %v1995_v57 = vpop.permute.xlu2 %633 }
 0x159   : > { %v492_v58 = vpop.permute.xlu0 %491 }
 0x15a   : > { %v509_v59 = vsel %vm505_vm2, %v486_v25, %v492_v58 }
 0x15b   : > { %v520_v3 = vmul.f32 %v509_v59, %v469_v1 }
 0x15e   : > { %873 = vrot.lane.b32.xlu2 %v1925_v29, %s1622_s20  ;;  %719 = vrot.lane.b32.xlu1 %v1910_v23, %s1619_s8 }
 0x15f   : > { %947 = vrot.lane.b32.xlu0 %v1925_v29, %s1623_s12 }
 0x160   : > { %v2005_v60 = vpop.permute.xlu1 %631  ;;  %v2007_v61 = vpop.permute.xlu2 %639 }
 0x161   : > { %v498_v62 = vpop.permute.xlu0 %497 }
 0x162   : > { %v506_v63 = vsel %vm505_vm2, %v492_v58, %v498_v62  ;;  %v515_v0 = vsel %vm505_vm2, %v498_v62, %v480_v27  ;;  %v532_v27 = vadd.f32 %v520_v3, %v457_v7  ;;  %v617_v58 = vld [vmem:[#allocation5 + $0xc0] sm:$0xff] }
 0x163   : > { %v518_v41 = vmul.f32 %v515_v0, %v467_v33  ;;  %v521_v42 = vmul.f32 %v506_v63, %v470_v34  ;;  %v666_v3 = vmul.f32 %v1968_v48, %v617_v58 }
 0x165   : > { %v530_v63 = vadd.f32 %v518_v41, %v455_v53  ;;  %v533_v0 = vadd.f32 %v521_v42, %v458_v49  ;;  %v448_v49 = vld [vmem:[#allocation5 + $0x1a8] sm:$0xff] }
 0x166   : > { %865 = vrot.lane.b32.xlu2 %v1836_v15, %s1622_s20  ;;  %851 = vrot.lane.b32.xlu1 %v1800_v9, %s1622_s20  ;;  %v472_v53 = vld [vmem:[#allocation5 + $0x28] sm:$0xff] }
 0x167   : > { %789 = vrot.lane.b32.xlu0 %v1810_v11, %s1618_s7 }
 0x168   : > { %v2019_v5 = vpop.permute.xlu1 %637  ;;  %v2021_v6 = vpop.permute.xlu2 %713 }
 0x169   : > { %v568_v8 = vpop.permute.xlu0 %567  ;;  %v2028_v21 = vsel %vm653_vm4, %v2005_v60, %v2019_v5 }
 0x16a   : > { %v583_v25 = vsel %vm579_vm3, %v562_v40, %v568_v8  ;;  %v546_v40 = vld [vmem:[#allocation5 + $0x78] sm:$0xff] }
 0x16b   : > { %v594_v28 = vmul.f32 %v583_v25, %v545_v4  ;;  %v620_v25 = vld [vmem:[#allocation5 + $0xd8] sm:$0xff] }
 0x16d   : > { %v606_v35 = vadd.f32 %v594_v28, %v532_v27 }
 0x16e   : > { %941 = vrot.lane.b32.xlu2 %v1910_v23, %s1623_s12  ;;  %927 = vrot.lane.b32.xlu1 %v1828_v14, %s1623_s12 }
 0x16f   : > { %869 = vrot.lane.b32.xlu0 %v1820_v13, %s1622_s20 }
 0x170   : > { %v2038_v44 = vpop.permute.xlu1 %711  ;;  %v2040_v47 = vpop.permute.xlu2 %781 }
 0x171   : > { %v574_v54 = vpop.permute.xlu0 %573 }
 0x172   : > { %v580_v59 = vsel %vm579_vm3, %v568_v8, %v574_v54  ;;  %v589_v62 = vsel %vm579_vm3, %v574_v54, %v1937_v32  ;;  %v619_v32 = vld [vmem:[#allocation5 + $0xd0] sm:$0xff] }
 0x173   : > { %v592_v1 = vmul.f32 %v589_v62, %v543_v43  ;;  %v595_v2 = vmul.f32 %v580_v59, %v546_v40  ;;  %v548_v59 = vld [vmem:[#allocation5 + $0x88] sm:$0xff]  ;;  %v587_v62 = vsel %vm579_vm3, %v1976_v50, %v1993_v56 }
 0x175   : > { %v604_v4 = vadd.f32 %v592_v1, %v530_v63  ;;  %v607_v7 = vadd.f32 %v595_v2, %v533_v0  ;;  %v460_v0 = vmul.f32 %v448_v49, %v1818_v12  ;;  %v622_v2 = vld [vmem:[#allocation5 + $0xe8] sm:$0xff] }
 0x176   : > { %1021 = vrot.lane.b32.xlu2 %v1925_v29, %s1624_s2  ;;  %1003 = vrot.lane.b32.xlu1 %v1852_v17, %s1624_s2 }
 0x177   : > { %945 = vrot.lane.b32.xlu0 %v1892_v19, %s1623_s12  ;;  %v2056_v8 = vadd.f32 %v666_v3, %v604_v4  ;;  %v597_v3 = vmul.f32 %v587_v62, %v548_v59  ;;  %v696_v4 = vld [vmem:[#allocation5 + $0x148] sm:$0xff]  ;;  %v473_v59 = vld [vmem:[#allocation5 + $0x30] sm:$0xff] }
 0x178   : > { %v2058_v27 = vpop.permute.xlu1 %779  ;;  %v2060_v28 = vpop.permute.xlu2 %929 }
 0x179   : > { %2585 = vst [vmem:[#allocation15_spill] sm:$0xff] %v2056_v8  ;;  %v642_v48 = vpop.permute.xlu0 %641  ;;  %v454_v8 = vld [vmem:[#allocation5 + $0x1d8] sm:$0xff] }
 0x17a   : > { %v654_v33 = vsel %vm653_vm4, %v642_v48, %v1946_v36  ;;  %v657_v34 = vsel %vm653_vm4, %v1980_v52, %v642_v48 }
 0x17b   : > { %v668_v37 = vmul.f32 %v657_v34, %v619_v32  ;;  %v669_v39 = vmul.f32 %v654_v33, %v620_v25  ;;  %v671_v32 = vmul.f32 %v2028_v21, %v622_v2 }
 0x17d   : > { %v2068_v41 = vadd.f32 %v668_v37, %v606_v35  ;;  %v2070_v42 = vadd.f32 %v669_v39, %v607_v7 }
 0x17e   : > { %861 = vrot.lane.b32.xlu2 %v1844_v16, %s1622_s20  ;;  %785 = vrot.lane.b32.xlu1 %v1818_v12, %s1618_s7 }
 0x17f   : > { %2586 = vst [vmem:[#allocation16_spill] sm:$0xff] %v2068_v41  ;;  %703 = vrot.lane.b32.xlu0 %v1800_v9, %s1619_s8  ;;  %v478_v41 = vld [vmem:[#allocation5 + $0x58] sm:$0xff]  ;;  %s1238_s8 = scalar_lea.hbm %s2571_s6, %s1371_s17 }
 0x180   : > { %2587 = vst [vmem:[#allocation17_spill] sm:$0xff] %v2070_v42  ;;  %v2079_v36 = vpop.permute.xlu1 %705  ;;  %v2081_v52 = vpop.permute.xlu2 %787  ;;  %s1242_s10 = sshll.u32 %s1238_s8, 4  ;;  %s1243_s10 = int_to_ptr.hbm [resolvable:$true] %s1242_s10 }
 0x181   : > { %v2083_v43 = vpop.permute.xlu0 %721  ;;  %v735_v35 = vsel %vm727_vm5, %v2079_v36, %v2038_v44  ;;  %s1555_s11 = sshra.s32 %s1243_s10, 4  ;;  %s1556_s11 = int_to_ptr.hbm [resolvable:$true] %s1555_s11 }
 0x182   : > { %v745_v48 = vmul.f32 %v735_v35, %v696_v4  ;;  %p1562_p12 = scmp.lt.s32.totalorder %s1556_s11, %s2571_s6 }
 0x186   : > { %939 = vrot.lane.b32.xlu2 %v1836_v15, %s1623_s12  ;;  %925 = vrot.lane.b32.xlu1 %v1800_v9, %s1623_s12 }
 0x187   : > { %863 = vrot.lane.b32.xlu0 %v1810_v11, %s1622_s20 }
 0x188   : > { %v494_v40 = vpop.permute.xlu1 %493  ;;  %v496_v54 = vpop.permute.xlu2 %495 }
 0x189   : > { %v482_v58 = vpop.permute.xlu0 %481  ;;  %v510_v35 = vsel %vm505_vm2, %v1908_v22, %v494_v40 }
 0x18a   : > { %v513_v63 = vsel %vm505_vm2, %v482_v58, %v1908_v22  ;;  %v524_v2 = vmul.f32 %v510_v35, %v473_v59 }
 0x18b   : > { %v523_v1 = vmul.f32 %v513_v63, %v472_v53  ;;  %v477_v63 = vld [vmem:[#allocation5 + $0x50] sm:$0xff] }
 0x18d   : > { %v535_v7 = vadd.f32 %v523_v1, %v460_v0  ;;  %v449_v1 = vld [vmem:[#allocation5 + $0x1b0] sm:$0xff] }
 0x18e   : > { %1015 = vrot.lane.b32.xlu2 %v1910_v23, %s1624_s2  ;;  %1001 = vrot.lane.b32.xlu1 %v1828_v14, %s1624_s2  ;;  %v461_v22 = vmul.f32 %v449_v1, %v1836_v15 }
 0x18f   : > { %v609_v25 = vadd.f32 %v597_v3, %v535_v7  ;;  %943 = vrot.lane.b32.xlu0 %v1820_v13, %s1623_s12  ;;  %v453_v3 = vld [vmem:[#allocation5 + $0x1d0] sm:$0xff] }
 0x190   : > { %v500_v33 = vpop.permute.xlu1 %499  ;;  %v2110_v34 = vpop.permute.xlu2 %501 }
 0x191   : > { %v507_v37 = vsel %vm505_vm2, %v494_v40, %v500_v33  ;;  %v516_v39 = vsel %vm505_vm2, %v500_v33, %v482_v58  ;;  %v650_v49 = vpop.permute.xlu0 %649  ;;  %v508_v53 = vsel %vm505_vm2, %v496_v54, %v2110_v34  ;;  %v683_v21 = vadd.f32 %v671_v32, %v609_v25  ;;  %v553_v40 = vld [vmem:[#allocation5 + $0xb0] sm:$0xff] }
 0x192   : > { %v2125_v62 = vsel %vm653_vm4, %v650_v49, %v2005_v60  ;;  %v511_v58 = vsel %vm505_vm2, %v1948_v38, %v496_v54  ;;  %v549_v60 = vld [vmem:[#allocation5 + $0x90] sm:$0xff]  ;;  %v465_v54 = vmul.f32 %v453_v3, %v1910_v23  ;;  %v536_v33 = vadd.f32 %v524_v2, %v461_v22  ;;  %v474_v2 = vld [vmem:[#allocation5 + $0x38] sm:$0xff] }
 0x193   : > { %v2130_v0 = vadd.f32 %v745_v48, %v683_v21  ;;  %v528_v4 = vmul.f32 %v511_v58, %v477_v63  ;;  %v623_v25 = vld [vmem:[#allocation5 + $0xf0] sm:$0xff]  ;;  %v658_v48 = vsel %vm653_vm4, %v2019_v5, %v1935_v31  ;;  %v471_v63 = vld [vmem:[#allocation5 + $0x20] sm:$0xff] }
 0x194   : > { %v697_v3 = vld [vmem:[#allocation5 + $0x150] sm:$0xff]  ;;  %v672_v22 = vmul.f32 %v658_v48, %v623_v25  ;;  %v522_v18 = vmul.f32 %v516_v39, %v471_v63  ;;  %v550_v25 = vld [vmem:[#allocation5 + $0x98] sm:$0xff]  ;;  %v462_v48 = vmul.f32 %v450_v55, %v1892_v19  ;;  %v459_v39 = vmul.f32 %v447_v45, %v1828_v14 }
 0x195   : > { %v540_v23 = vadd.f32 %v528_v4, %v465_v54  ;;  %v525_v4 = vmul.f32 %v507_v37, %v474_v2  ;;  %v466_v37 = vmul.f32 %v454_v8, %v1925_v29  ;;  %v624_v63 = vld [vmem:[#allocation5 + $0xf8] sm:$0xff] }
 0x196   : > { %859 = vrot.lane.b32.xlu2 %v1818_v12, %s1622_s20  ;;  %783 = vrot.lane.b32.xlu1 %v1802_v10, %s1618_s7  ;;  %v534_v45 = vadd.f32 %v522_v18, %v459_v39 }
 0x197   : > { %1019 = vrot.lane.b32.xlu0 %v1892_v19, %s1624_s2  ;;  %v537_v55 = vadd.f32 %v525_v4, %v462_v48 }
 0x198   : > { %v570_v7 = vpop.permute.xlu1 %569  ;;  %v572_v32 = vpop.permute.xlu2 %571 }
 0x199   : > { %v584_v21 = vsel %vm579_vm3, %v1993_v56, %v570_v7  ;;  %v2147_v59 = vpop.permute.xlu0 %717  ;;  %v585_v35 = vsel %vm579_vm3, %v1978_v51, %v572_v32 }
 0x19a   : > { %v598_v58 = vmul.f32 %v584_v21, %v549_v60  ;;  %v732_v1 = vsel %vm727_vm5, %v2038_v44, %v2147_v59  ;;  %v602_v5 = vmul.f32 %v585_v35, %v553_v40  ;;  %v529_v44 = vmul.f32 %v508_v53, %v478_v41  ;;  %v547_v40 = vld [vmem:[#allocation5 + $0x80] sm:$0xff]  ;;  %v554_v35 = vld [vmem:[#allocation5 + $0xb8] sm:$0xff] }
 0x19b   : > { %v746_v60 = vmul.f32 %v732_v1, %v697_v3  ;;  %v655_v41 = vsel %vm653_vm4, %v1935_v31, %v650_v49 }
 0x19c   : > { %v610_v56 = vadd.f32 %v598_v58, %v536_v33  ;;  %v2156_v42 = vadd.f32 %v602_v5, %v540_v23  ;;  %v541_v1 = vadd.f32 %v529_v44, %v466_v37  ;;  %v673_v49 = vmul.f32 %v655_v41, %v624_v63 }
 0x19e   : > { %v684_v54 = vadd.f32 %v672_v22, %v610_v56  ;;  %999 = vrot.lane.b32.xlu2 %v1800_v9, %s1624_s2  ;;  %937 = vrot.lane.b32.xlu1 %v1810_v11, %s1623_s12  ;;  %v621_v9 = vld [vmem:[#allocation5 + $0xe0] sm:$0xff]  ;;  %v698_v22 = vld [vmem:[#allocation5 + $0x158] sm:$0xff]  ;;  %v771_v56 = vld [vmem:[#allocation5 + $0x210] sm:$0xff] }
 0x19f   : > { %935 = vrot.lane.b32.xlu0 %v1844_v16, %s1623_s12  ;;  %v670_v31 = vmul.f32 %v2125_v62, %v621_v9 }
 0x1a0   : > { %v758_v33 = vadd.f32 %v746_v60, %v684_v54  ;;  %v576_v21 = vpop.permute.xlu1 %575  ;;  %v2167_v23 = vpop.permute.xlu2 %577  ;;  %v772_v54 = vld [vmem:[#allocation5 + $0x218] sm:$0xff] }
 0x1a1   : > { %v581_v53 = vsel %vm579_vm3, %v570_v7, %v576_v21  ;;  %v590_v14 = vsel %vm579_vm3, %v576_v21, %v1976_v50  ;;  %v798_v19 = vpop.permute.xlu0 %797  ;;  %v582_v29 = vsel %vm579_vm3, %v572_v32, %v2167_v23  ;;  %v695_v32 = vld [vmem:[#allocation5 + $0x140] sm:$0xff] }
 0x1a2   : > { %v596_v8 = vmul.f32 %v590_v14, %v547_v40  ;;  %v599_v58 = vmul.f32 %v581_v53, %v550_v25  ;;  %v603_v5 = vmul.f32 %v582_v29, %v554_v35  ;;  %v812_v60 = vsel %vm801_vm6, %v798_v19, %v2058_v27 }
 0x1a3   : > { %v821_v37 = vmul.f32 %v812_v60, %v772_v54 }
 0x1a4   : > { %v608_v2 = vadd.f32 %v596_v8, %v534_v45  ;;  %v611_v7 = vadd.f32 %v599_v58, %v537_v55  ;;  %v2181_v3 = vadd.f32 %v603_v5, %v541_v1  ;;  %v452_v45 = vld [vmem:[#allocation5 + $0x1c8] sm:$0xff]  ;;  %v451_v55 = vld [vmem:[#allocation5 + $0x1c0] sm:$0xff] }
 0x1a5   : > { %v475_v8 = vld [vmem:[#allocation5 + $0x40] sm:$0xff]  ;;  %v476_v58 = vld [vmem:[#allocation5 + $0x48] sm:$0xff] }
 0x1a6   : > { %857 = vrot.lane.b32.xlu2 %v1802_v10, %s1622_s20  ;;  %1017 = vrot.lane.b32.xlu1 %v1820_v13, %s1624_s2  ;;  %v682_v50 = vadd.f32 %v670_v31, %v608_v2  ;;  %v685_v18 = vadd.f32 %v673_v49, %v611_v7  ;;  %v552_v31 = vld [vmem:[#allocation5 + $0xa8] sm:$0xff]  ;;  %v588_v49 = vsel %vm579_vm3, %v1963_v46, %v1978_v51  ;;  %v551_v2 = vld [vmem:[#allocation5 + $0xa0] sm:$0xff]  ;;  %s1557_s20 = scalar_lea.hbm %s1556_s11, 16 }
 0x1a7   : > { %1013 = vrot.lane.b32.xlu0 %v1836_v15, %s1624_s2  ;;  %p1558_p1 = scmp.ne.s32.totalorder %s1556_s11, %s1557_s20  ;;  %p1563_p7 = scmp.lt.s32.totalorder %s1561_s29, %s1557_s20 }
 0x1a8   : > { %v724_v62 = vpop.permute.xlu1 %723  ;;  %v2190_v4 = vpop.permute.xlu2 %725 }
 0x1a9   : > { %v729_v13 = vsel %vm727_vm5, %v2147_v59, %v724_v62  ;;  %v738_v15 = vsel %vm727_vm5, %v724_v62, %v2079_v36  ;;  %v2201_v44 = vpop.permute.xlu0 %791  ;;  %v846_v59 = vld [vmem:[#allocation5 + $0x278] sm:$0xff]  ;;  %v626_v62 = vld [vmem:[#allocation5 + $0x108] sm:$0xff]  ;;  %p1559_p3 = pnand %p1558_p1, %p1730_p4  ;;  %p1564_p8 = por %p1563_p7, %p1562_p12 }
 0x1aa   : > { %v744_v40 = vmul.f32 %v738_v15, %v695_v32  ;;  %v747_v25 = vmul.f32 %v729_v13, %v698_v22  ;;  %v803_v48 = vsel %vm801_vm6, %v2201_v44, %v798_v19  ;;  %v463_v32 = vmul.f32 %v451_v55, %v1852_v17  ;;  %v700_v13 = vld [vmem:[#allocation5 + $0x168] sm:$0xff]  ;;  %v845_v15 = vld [vmem:[#allocation5 + $0x270] sm:$0xff]  ;;  %v625_v55 = vld [vmem:[#allocation5 + $0x100] sm:$0xff] }
 0x1ab   : > { %v820_v39 = vmul.f32 %v803_v48, %v771_v56  ;;  %p1560_p5 = pneg %p1559_p3 }
 0x1ac   : > { %v2206_v21 = vadd.f32 %v744_v40, %v682_v50  ;;  %v759_v35 = vadd.f32 %v747_v25, %v685_v18  ;;  %v464_v18 = vmul.f32 %v452_v45, %v1844_v16  ;;  %v774_v40 = vld [vmem:[#allocation5 + $0x228] sm:$0xff] }
 0x1ad   : > { %v832_v9 = vadd.f32 %v820_v39, %v758_v33  ;;  %p1565_p9 = pnand %p1564_p8, %p1560_p5 }
 0x1ae   : > { %1011 = vrot.lane.b32.xlu2 %v1810_v11, %s1624_s2  ;;  %1009 = vrot.lane.b32.xlu1 %v1844_v16, %s1624_s2  ;;  %v833_v36 = vadd.f32 %v821_v37, %v759_v35 }
 0x1af   : > { %933 = vrot.lane.b32.xlu0 %v1818_v12, %s1623_s12 }
 0x1b0   : > { %v872_v63 = vpop.permute.xlu1 %871  ;;  %v2215_v41 = vpop.permute.xlu2 %793 }
 0x1b1   : > { %v886_v33 = vsel %vm875_vm7, %v872_v63, %v1921_v26  ;;  %v708_v53 = vpop.permute.xlu0 %707  ;;  %v807_v11 = vsel %vm801_vm6, %v2081_v52, %v2215_v41 }
 0x1b2   : > { %v895_v14 = vmul.f32 %v886_v33, %v846_v59  ;;  %v739_v19 = vsel %vm727_vm5, %v2190_v4, %v708_v53  ;;  %v736_v16 = vsel %vm727_vm5, %v708_v53, %v2021_v6  ;;  %v823_v33 = vmul.f32 %v807_v11, %v774_v40 }
 0x1b3   : > { %v749_v37 = vmul.f32 %v736_v16, %v700_v13 }
 0x1b4   : > { %v2227_v29 = vadd.f32 %v895_v14, %v833_v36 }
 0x1b6   : > { %1005 = vrot.lane.b32.xlu2 %v1802_v10, %s1624_s2  ;;  %1007 = vrot.lane.b32.xlu1 %v1818_v12, %s1624_s2  ;;  %v591_v12 = vsel %vm579_vm3, %v2167_v23, %v1963_v46  ;;  %v662_v46 = vsel %vm653_vm4, %v1995_v57, %v2007_v61  ;;  %v601_v23 = vmul.f32 %v588_v49, %v552_v31 }
 0x1b7   : > { %931 = vrot.lane.b32.xlu0 %v1802_v10, %s1623_s12  ;;  %v600_v56 = vmul.f32 %v591_v12, %v551_v2  ;;  %v675_v60 = vmul.f32 %v662_v46, %v626_v62  ;;  %v773_v12 = vld [vmem:[#allocation5 + $0x220] sm:$0xff]  ;;  %v627_v62 = vld [vmem:[#allocation5 + $0x110] sm:$0xff]  ;;  %v628_v46 = vld [vmem:[#allocation5 + $0x118] sm:$0xff] }
 0x1b8   : > { %v2235_v1 = vpop.permute.xlu2 %873  ;;  %v484_v5 = vpop.permute.xlu1 %483 }
 0x1b9   : > { %v646_v7 = vpop.permute.xlu0 %645  ;;  %v514_v10 = vsel %vm505_vm2, %v484_v5, %v1948_v38  ;;  %v517_v50 = vsel %vm505_vm2, %v2110_v34, %v484_v5  ;;  %v699_v5 = vld [vmem:[#allocation5 + $0x160] sm:$0xff] }
 0x1ba   : > { %v526_v51 = vmul.f32 %v517_v50, %v475_v8  ;;  %v527_v22 = vmul.f32 %v514_v10, %v476_v58 }
 0x1bc   : > { %v538_v54 = vadd.f32 %v526_v51, %v463_v32  ;;  %v539_v38 = vadd.f32 %v527_v22, %v464_v18 }
 0x1be   : > { %v613_v34 = vadd.f32 %v601_v23, %v539_v38  ;;  %v612_v17 = vadd.f32 %v600_v56, %v538_v54  ;;  %v701_v56 = vld [vmem:[#allocation5 + $0x170] sm:$0xff]  ;;  %v847_v38 = vld [vmem:[#allocation5 + $0x280] sm:$0xff] }
 0x1c0   : > { %v687_v25 = vadd.f32 %v675_v60, %v613_v34  ;;  %v2260_v48 = vpop.permute.xlu2 %865  ;;  %v2262_v39 = vpop.permute.xlu1 %855  ;;  %v848_v60 = vld [vmem:[#allocation5 + $0x288] sm:$0xff] }
 0x1c1   : > { %v800_v35 = vpop.permute.xlu0 %799  ;;  %v877_v36 = vsel %vm875_vm7, %v2260_v48, %v872_v63  ;;  %v810_v63 = vsel %vm801_vm6, %v2040_v47, %v2081_v52  ;;  %v702_v52 = vld [vmem:[#allocation5 + $0x178] sm:$0xff] }
 0x1c2   : > { %v894_v59 = vmul.f32 %v877_v36, %v845_v15  ;;  %v761_v14 = vadd.f32 %v749_v37, %v687_v25  ;;  %v822_v10 = vmul.f32 %v810_v63, %v773_v12 }
 0x1c4   : > { %v2267_v45 = vadd.f32 %v894_v59, %v832_v9  ;;  %v835_v53 = vadd.f32 %v823_v33, %v761_v14  ;;  %v748_v9 = vmul.f32 %v739_v19, %v699_v5  ;;  %v775_v14 = vld [vmem:[#allocation5 + $0x230] sm:$0xff]  ;;  %v813_v5 = vsel %vm801_vm6, %v800_v35, %v2040_v47 }
 0x1c8   : > { %v2269_v8 = vpop.permute.xlu2 %941  ;;  %v652_v58 = vpop.permute.xlu1 %651 }
 0x1c9   : > { %v868_v31 = vpop.permute.xlu0 %867  ;;  %v665_v49 = vsel %vm653_vm4, %v652_v58, %v1995_v57  ;;  %v659_v57 = vsel %vm653_vm4, %v2007_v61, %v646_v7  ;;  %v656_v23 = vsel %vm653_vm4, %v646_v7, %v652_v58  ;;  %v804_v58 = vsel %vm801_vm6, %v2215_v41, %v800_v35 }
 0x1ca   : > { %v674_v2 = vmul.f32 %v665_v49, %v625_v55  ;;  %v676_v13 = vmul.f32 %v659_v57, %v627_v62  ;;  %v677_v16 = vmul.f32 %v656_v23, %v628_v46  ;;  %v776_v55 = vld [vmem:[#allocation5 + $0x238] sm:$0xff]  ;;  %v824_v12 = vmul.f32 %v804_v58, %v775_v14  ;;  %v997_v46 = vld [vmem:[#allocation5 + $0x350] sm:$0xff]  ;;  %v770_v14 = vld [vmem:[#allocation5 + $0x208] sm:$0xff] }
 0x1cb   : > { %v878_v41 = vsel %vm875_vm7, %v868_v31, %v2235_v1  ;;  %v924_v62 = vld [vmem:[#allocation5 + $0x2f8] sm:$0xff] }
 0x1cc   : > { %v686_v11 = vadd.f32 %v674_v2, %v612_v17  ;;  %v688_v37 = vadd.f32 %v676_v13, %v2156_v42  ;;  %v689_v36 = vadd.f32 %v677_v16, %v2181_v3  ;;  %v825_v42 = vmul.f32 %v813_v5, %v776_v55  ;;  %v998_v23 = vld [vmem:[#allocation5 + $0x358] sm:$0xff] }
 0x1ce   : > { %v760_v50 = vadd.f32 %v748_v9, %v686_v11  ;;  %v887_v9 = vsel %vm875_vm7, %v2235_v1, %v2262_v39  ;;  %v849_v11 = vld [vmem:[#allocation5 + $0x290] sm:$0xff] }
 0x1d0   : > { %v2278_v18 = vpop.permute.xlu2 %1021  ;;  %v720_v32 = vpop.permute.xlu1 %719  ;;  %v834_v51 = vadd.f32 %v822_v10, %v760_v50 }
 0x1d1   : > { %v948_v22 = vpop.permute.xlu0 %947  ;;  %v730_v19 = vsel %vm727_vm5, %v720_v32, %v2190_v4  ;;  %v733_v54 = vsel %vm727_vm5, %v2021_v6, %v720_v32  ;;  %v898_v32 = vmul.f32 %v878_v41, %v849_v11 }
 0x1d2   : > { %v750_v15 = vmul.f32 %v733_v54, %v701_v56  ;;  %v751_v40 = vmul.f32 %v730_v19, %v702_v52  ;;  %v952_v57 = vsel %vm949_vm8, %v2269_v8, %v948_v22 }
 0x1d4   : > { %v762_v49 = vadd.f32 %v750_v15, %v688_v37  ;;  %v763_v2 = vadd.f32 %v751_v40, %v689_v36  ;;  %v1071_v15 = vld [vmem:[#allocation7 + $0x58] sm:$0xff] }
 0x1d6   : > { %v836_v35 = vadd.f32 %v824_v12, %v762_v49  ;;  %v837_v10 = vadd.f32 %v825_v42, %v763_v2  ;;  %v844_v2 = vld [vmem:[#allocation5 + $0x268] sm:$0xff] }
 0x1d8   : > { %v862_v34 = vpop.permute.xlu2 %861  ;;  %v2291_v61 = vpop.permute.xlu1 %851  ;;  %v910_v1 = vadd.f32 %v898_v32, %v836_v35 }
 0x1d9   : > { %v2293_v17 = vpop.permute.xlu0 %789  ;;  %v881_v7 = vsel %vm875_vm7, %v862_v34, %v868_v31  ;;  %v884_v4 = vsel %vm875_vm7, %v2262_v39, %v862_v34  ;;  %v961_v39 = vsel %vm949_vm8, %v948_v22, %v2060_v28 }
 0x1da   : > { %v896_v25 = vmul.f32 %v884_v4, %v847_v38  ;;  %v897_v6 = vmul.f32 %v881_v7, %v848_v60  ;;  %v973_v52 = vmul.f32 %v961_v39, %v924_v62  ;;  %v1070_v4 = vld [vmem:[#allocation7 + $0x50] sm:$0xff]  ;;  %v920_v39 = vld [vmem:[#allocation5 + $0x2d8] sm:$0xff] }
 0x1dc   : > { %v2302_v59 = vadd.f32 %v896_v25, %v834_v51  ;;  %v2304_v33 = vadd.f32 %v897_v6, %v835_v53  ;;  %v850_v53 = vld [vmem:[#allocation5 + $0x298] sm:$0xff]  ;;  %v923_v51 = vld [vmem:[#allocation5 + $0x2f0] sm:$0xff] }
 0x1dd   : > { %v899_v50 = vmul.f32 %v887_v9, %v850_v53  ;;  %v972_v56 = vmul.f32 %v952_v57, %v923_v51  ;;  %v692_v57 = vld [vmem:[#allocation5 + $0x128] sm:$0xff] }
 0x1df   : > { %v911_v31 = vadd.f32 %v899_v50, %v837_v10  ;;  %v984_v34 = vadd.f32 %v972_v56, %v910_v1 }
 0x1e0   : > { %v2312_v63 = vpop.permute.xlu2 %939  ;;  %v2314_v3 = vpop.permute.xlu1 %927 }
 0x1e1   : > { %v2323_v47 = vpop.permute.xlu0 %869  ;;  %v985_v7 = vadd.f32 %v973_v52, %v911_v31  ;;  %v765_v52 = vld [vmem:[#allocation5 + $0x1e0] sm:$0xff] }
 0x1e8   : > { %v2333_v19 = vpop.permute.xlu2 %1015  ;;  %v2335_v54 = vpop.permute.xlu1 %1003 }
 0x1e9   : > { %v2337_v38 = vpop.permute.xlu0 %945  ;;  %v1026_v60 = vsel %vm1023_vm9, %v2333_v19, %v2278_v18  ;;  %v1035_v22 = vsel %vm1023_vm9, %v2278_v18, %v2335_v54 }
 0x1ea   : > { %v1046_v13 = vmul.f32 %v1026_v60, %v997_v46  ;;  %v1047_v16 = vmul.f32 %v1035_v22, %v998_v23  ;;  %v960_v1 = vsel %vm949_vm8, %v2337_v38, %v2314_v3  ;;  %v766_v60 = vld [vmem:[#allocation5 + $0x1e8] sm:$0xff]  ;;  %v694_v22 = vld [vmem:[#allocation5 + $0x138] sm:$0xff] }
 0x1eb   : > { %v969_v56 = vmul.f32 %v960_v1, %v920_v39  ;;  %v2591_v39 = vld [vmem:[#allocation13_spill] sm:$0xff] }
 0x1ec   : > { %v1058_v40 = vadd.f32 %v1046_v13, %v984_v34  ;;  %v1059_v25 = vadd.f32 %v1047_v16, %v985_v7  ;;  %v728_v13 = vsel %vm727_vm5, %v1900_v20, %v2083_v43  ;;  %v994_v16 = vld [vmem:[#allocation5 + $0x338] sm:$0xff] }
 0x1ed   : > { %v2588_v7 = vld [vmem:[#allocation15_spill] sm:$0xff] }
 0x1ee   : > { %v1082_v6 = vadd.f32 %v1070_v4, %v1058_v40  ;;  %v1083_v37 = vadd.f32 %v1071_v15, %v1059_v25  ;;  %v839_v15 = vld [vmem:[#allocation5 + $0x240] sm:$0xff] }
 0x1f0   : > { %v2347_v36 = vpop.permute.xlu2 %859  ;;  %v2349_v55 = vpop.permute.xlu1 %785  ;;  %v1094_v58 = vmax.f32 %v1082_v6, 0.0  ;;  %v1095_v5 = vmax.f32 %v1083_v37, 0.0  ;;  %v2589_v37 = vld [vmem:[#allocation12_spill] sm:$0xff] }
 0x1f1   : > { %v704_v49 = vpop.permute.xlu0 %703  ;;  %v806_v18 = vsel %vm801_vm6, %v2349_v55, %v2201_v44  ;;  %v880_v12 = vsel %vm875_vm7, %v2347_v36, %v2260_v48  ;;  %v691_v48 = vld [vmem:[#allocation5 + $0x120] sm:$0xff]  ;;  %v811_v1 = vsel %vm801_vm6, %v2591_v39, %v2589_v37 }
 0x1f2   : > { %v819_v42 = vmul.f32 %v806_v18, %v770_v14  ;;  %v1106_v53 = vmin.f32 %v1094_v58, 6.0  ;;  %v1107_v9 = vmin.f32 %v1095_v5, 6.0  ;;  %v893_v11 = vmul.f32 %v880_v12, %v844_v2  ;;  %v2590_v14 = vld [vmem:[#allocation14_spill] sm:$0xff] }
 0x1f3   : > { %v737_v62 = vsel %vm727_vm5, %v2083_v43, %v704_v49  ;;  %v743_v2 = vmul.f32 %v728_v13, %v694_v22  ;;  %v981_v12 = vadd.f32 %v969_v56, %v2227_v29  ;;  %v767_v56 = vld [vmem:[#allocation5 + $0x1f0] sm:$0xff] }
 0x1f4   : > { %v831_v41 = vadd.f32 %v819_v42, %v2130_v0  ;;  %1172 = vmatpush.msrb.mxu2 %v1106_v53  ;;  %1192 = vmatpush.msrb.mxu3 %v1107_v9  ;;  %v734_v0 = vsel %vm727_vm5, %v704_v49, %v1933_v30  ;;  %v740_v31 = vmul.f32 %v737_v62, %v691_v48  ;;  %v693_v48 = vld [vmem:[#allocation5 + $0x130] sm:$0xff] }
 0x1f5   : > { %v741_v46 = vmul.f32 %v734_v0, %v692_v57  ;;  %v731_v62 = vsel %vm727_vm5, %v1933_v30, %v1900_v20  ;;  %v768_v0 = vld [vmem:[#allocation5 + $0x1f8] sm:$0xff]  ;;  %v885_v20 = vsel %vm875_vm7, %v2323_v47, %v2291_v61 }
 0x1f6   : > { %v2360_v35 = vadd.f32 %v893_v11, %v831_v41  ;;  %v752_v4 = vadd.f32 %v740_v31, %v2588_v7  ;;  %v1067_v41 = vld [vmem:[#allocation7 + $0x38] sm:$0xff]  ;;  %v2592_v31 = vld [vmem:[#allocation17_spill] sm:$0xff]  ;;  %v742_v22 = vmul.f32 %v731_v62, %v693_v48 }
 0x1f7   : > { %v753_v58 = vadd.f32 %v741_v46, %v2590_v14  ;;  %v755_v46 = vadd.f32 %v743_v2, %v2592_v31  ;;  %v769_v2 = vld [vmem:[#allocation5 + $0x200] sm:$0xff] }
 0x1f8   : > { %v2362_v10 = vpop.permute.xlu1 %925  ;;  %v2366_v44 = vpop.permute.xlu2 %999 }
 0x1f9   : > { %v2364_v50 = vpop.permute.xlu0 %863 }
 0x1fa   : > { %v876_v7 = vsel %vm875_vm7, %v2364_v50, %v2323_v47  ;;  %v951_v47 = vsel %vm949_vm8, %v2312_v63, %v2337_v38  ;;  %v883_v38 = vsel %vm875_vm7, %v1921_v26, %v2347_v36 }
 0x200   : > { %v2368_v32 = vpop.permute.xlu1 %1001  ;;  %v2380_v23 = vpop.permute.xlu2 %857 }
 0x201   : > { %v944_v51 = vpop.permute.xlu0 %943  ;;  %v882_v40 = vsel %vm875_vm7, %v2291_v61, %v2380_v23 }
 0x202   : > { %v888_v53 = vmul.f32 %v882_v40, %v839_v15 }
 0x208   : > { %v784_v34 = vpop.permute.xlu1 %783  ;;  %v2451_v31 = vpop.permute.xlu2 %1011 }
 0x209   : > { %v2391_v25 = vpop.permute.xlu0 %1019  ;;  %v805_v6 = vsel %vm801_vm6, %v784_v34, %v2293_v17  ;;  %v808_v43 = vsel %vm801_vm6, %v2589_v37, %v784_v34  ;;  %v841_v34 = vld [vmem:[#allocation5 + $0x250] sm:$0xff]  ;;  %v2593_v37 = vld [vmem:[#allocation16_spill] sm:$0xff] }
 0x20a   : > { %v1034_v5 = vsel %vm1023_vm9, %v2391_v25, %v2368_v32  ;;  %v814_v49 = vmul.f32 %v808_v43, %v765_v52  ;;  %v815_v18 = vmul.f32 %v805_v6, %v766_v60  ;;  %v802_v52 = vsel %vm801_vm6, %v2293_v17, %v2591_v39  ;;  %v842_v60 = vld [vmem:[#allocation5 + $0x258] sm:$0xff] }
 0x20b   : > { %v1043_v42 = vmul.f32 %v1034_v5, %v994_v16  ;;  %v817_v16 = vmul.f32 %v811_v1, %v768_v0  ;;  %v959_v17 = vsel %vm949_vm8, %v944_v51, %v2362_v10  ;;  %v816_v6 = vmul.f32 %v802_v52, %v767_v56  ;;  %v990_v0 = vld [vmem:[#allocation5 + $0x318] sm:$0xff]  ;;  %v921_v56 = vld [vmem:[#allocation5 + $0x2e0] sm:$0xff]  ;;  %v922_v52 = vld [vmem:[#allocation5 + $0x2e8] sm:$0xff] }
 0x20c   : > { %v826_v9 = vadd.f32 %v814_v49, %v752_v4  ;;  %v2405_v11 = vadd.f32 %v815_v18, %v753_v58  ;;  %v916_v4 = vld [vmem:[#allocation5 + $0x2b8] sm:$0xff]  ;;  %v891_v61 = vmul.f32 %v885_v20, %v842_v60  ;;  %v754_v43 = vadd.f32 %v742_v22, %v2593_v37  ;;  %v915_v58 = vld [vmem:[#allocation5 + $0x2b0] sm:$0xff] }
 0x20d   : > { %v1055_v57 = vadd.f32 %v1043_v42, %v981_v12  ;;  %v829_v14 = vadd.f32 %v817_v16, %v755_v46  ;;  %v919_v18 = vld [vmem:[#allocation5 + $0x2d0] sm:$0xff]  ;;  %v809_v12 = vsel %vm801_vm6, %v2058_v27, %v2349_v55  ;;  %v890_v42 = vmul.f32 %v876_v7, %v841_v34  ;;  %v1109_v46 = vld [vmem:[%s2570_s5] sm:$0xf]  ;;  %v843_v16 = vld [vmem:[#allocation5 + $0x260] sm:$0xff] }
 0x20e   : > { %v2415_v29 = vadd.f32 %v888_v53, %v826_v9  ;;  %v965_v53 = vmul.f32 %v959_v17, %v916_v4  ;;  %v828_v9 = vadd.f32 %v816_v6, %v754_v43  ;;  %v818_v62 = vmul.f32 %v809_v12, %v769_v2  ;;  %v993_v27 = vld [vmem:[#allocation5 + $0x330] sm:$0xff]  ;;  %v995_v2 = vld [vmem:[#allocation5 + $0x340] sm:$0xff] }
 0x20f   : > { %v1079_v30 = vadd.f32 %v1067_v41, %v1055_v57  ;;  %v903_v41 = vadd.f32 %v891_v61, %v829_v14  ;;  %v989_v57 = vld [vmem:[#allocation5 + $0x310] sm:$0xff]  ;;  %v1625_v22 = vmov 0  }
 0x210   : > { %v2426_v13 = vpop.permute.xlu1 %937  ;;  %v902_v39 = vadd.f32 %v890_v42, %v828_v9  ;;  %1450 = vset.pattern.permute.xlu0 %v1625_v22  ;;  %v830_v17 = vadd.f32 %v818_v62, %v2206_v21  ;;  %v1062_v6 = vld [vmem:[#allocation7 + $0x10] sm:$0xff]  ;;  %v996_v21 = vld [vmem:[#allocation5 + $0x348] sm:$0xff]  ;;  %v917_v9 = vld [vmem:[#allocation5 + $0x2c0] sm:$0xff]  ;;  %v1006_v22 = vpop.permute.xlu2 %1005 }
 0x211   : > { %v936_v15 = vpop.permute.xlu0 %935  ;;  %v1091_v40 = vmax.f32 %v1079_v30, 0.0  ;;  %v950_v5 = vsel %vm949_vm8, %v2426_v13, %v944_v51  ;;  %v968_v51 = vmul.f32 %v951_v47, %v919_v18  ;;  %v977_v1 = vadd.f32 %v965_v53, %v903_v41  ;;  %1112 = vperm.xlu0 %1450, %v1109_v46   ;;  %v1066_v43 = vld [vmem:[#allocation7 + $0x30] sm:$0xff]  ;;  %v918_v41 = vld [vmem:[#allocation5 + $0x2c8] sm:$0xff] }
 0x212   : > { %v964_v48 = vmul.f32 %v950_v5, %v915_v58  ;;  %v955_v60 = vsel %vm949_vm8, %v936_v15, %v2269_v8  ;;  %v958_v26 = vsel %vm949_vm8, %v2060_v28, %v936_v15  ;;  %v892_v5 = vmul.f32 %v883_v38, %v843_v16  ;;  %v840_v38 = vld [vmem:[#allocation5 + $0x248] sm:$0xff] }
 0x213   : > { %v1103_v49 = vmin.f32 %v1091_v40, 6.0  ;;  %v980_v4 = vadd.f32 %v968_v51, %v2267_v45  ;;  %v1063_v40 = vld [vmem:[#allocation7 + $0x18] sm:$0xff]  ;;  %v970_v61 = vmul.f32 %v958_v26, %v921_v56  ;;  %v971_v37 = vmul.f32 %v955_v60, %v922_v52  ;;  %v1068_v56 = vld [vmem:[#allocation7 + $0x40] sm:$0xff]  ;;  %v1069_v52 = vld [vmem:[#allocation7 + $0x48] sm:$0xff] }
 0x214   : > { %v976_v34 = vadd.f32 %v964_v48, %v902_v39  ;;  %v904_v45 = vadd.f32 %v892_v5, %v830_v17 }
 0x215   : > { %1193 = vmatpush.msrb.mxu3 %v1103_v49  ;;  %v982_v42 = vadd.f32 %v970_v61, %v2302_v59  ;;  %v983_v53 = vadd.f32 %v971_v37, %v2304_v33  ;;  %v1027_v61 = vsel %vm1023_vm9, %v1006_v22, %v2451_v31  ;;  %v1030_v37 = vsel %vm1023_vm9, %v2366_v44, %v1006_v22 }
 0x218   : > { %v1018_v55 = vpop.permute.xlu1 %1017 }
 0x219   : > { %v2462_v36 = vpop.permute.xlu0 %1013  ;;  %v1024_v20 = vsel %vm1023_vm9, %v2451_v31, %v1018_v55  ;;  %v1033_v30 = vsel %vm1023_vm9, %v1018_v55, %v2366_v44 }
 0x21a   : > { %v1025_v8 = vsel %vm1023_vm9, %v2462_v36, %v2391_v25  ;;  %v1038_v28 = vmul.f32 %v1024_v20, %v989_v57  ;;  %v1039_v7 = vmul.f32 %v1033_v30, %v990_v0  ;;  %v879_v25 = vsel %vm875_vm7, %v2380_v23, %v2364_v50 }
 0x21b   : > { %v1042_v15 = vmul.f32 %v1025_v8, %v993_v27  ;;  %v889_v30 = vmul.f32 %v879_v25, %v840_v38  ;;  %v991_v8 = vld [vmem:[#allocation5 + $0x320] sm:$0xff] }
 0x21c   : > { %v1051_v14 = vadd.f32 %v1039_v7, %v977_v1  ;;  %v1050_v58 = vadd.f32 %v1038_v28, %v976_v34  ;;  %v992_v28 = vld [vmem:[#allocation5 + $0x328] sm:$0xff]  ;;  %v913_v7 = vld [vmem:[#allocation5 + $0x2a0] sm:$0xff] }
 0x21d   : > { %v1054_v49 = vadd.f32 %v1042_v15, %v980_v4  ;;  %v914_v4 = vld [vmem:[#allocation5 + $0x2a8] sm:$0xff]  ;;  %v901_v17 = vadd.f32 %v889_v30, %v2405_v11  ;;  %v1203_v30 = vld.sshfl [vmem:[#allocation1 + $0x8] sm:$0xff pattern:$0x75316420] }
 0x21e   : > { %v1075_v18 = vadd.f32 %v1063_v40, %v1051_v14  ;;  %v1074_v47 = vadd.f32 %v1062_v6, %v1050_v58  ;;  %v987_v6 = vld [vmem:[#allocation5 + $0x300] sm:$0xff]  ;;  %v988_v58 = vld [vmem:[#allocation5 + $0x308] sm:$0xff] }
 0x21f   : > { %v1078_v12 = vadd.f32 %v1066_v43, %v1054_v49 }
 0x220   : > { %v1010_v48 = vpop.permute.xlu1 %1009  ;;  %v1087_v51 = vmax.f32 %v1075_v18, 0.0  ;;  %v1086_v0 = vmax.f32 %v1074_v47, 0.0 }
 0x221   : > { %v934_v62 = vpop.permute.xlu0 %933  ;;  %v1029_v57 = vsel %vm1023_vm9, %v1010_v48, %v2333_v19  ;;  %v1032_v50 = vsel %vm1023_vm9, %v2335_v54, %v1010_v48  ;;  %v1090_v23 = vmax.f32 %v1078_v12, 0.0  ;;  %v2497_v54 = vld [vmem:[%s2569_s4] sm:$0xf] }
 0x222   : > { %v954_v59 = vsel %vm949_vm8, %v934_v62, %v2312_v63  ;;  %v957_v33 = vsel %vm949_vm8, %v2314_v3, %v934_v62  ;;  %v1044_v39 = vmul.f32 %v1032_v50, %v995_v2  ;;  %v1045_v1 = vmul.f32 %v1029_v57, %v996_v21  ;;  %v1065_v2 = vld [vmem:[#allocation7 + $0x28] sm:$0xff] }
 0x223   : > { %v966_v27 = vmul.f32 %v957_v33, %v917_v9  ;;  %v967_v55 = vmul.f32 %v954_v59, %v918_v41  ;;  %v1102_v19 = vmin.f32 %v1090_v23, 6.0  ;;  %v1099_v46 = vmin.f32 %v1087_v51, 6.0  ;;  %v1061_v41 = vld [vmem:[#allocation7 + $0x8] sm:$0xff] }
 0x224   : > { %v1056_v60 = vadd.f32 %v1044_v39, %v982_v42  ;;  %v1057_v26 = vadd.f32 %v1045_v1, %v983_v53  ;;  %v1098_v3 = vmin.f32 %v1086_v0, 6.0  ;;  %v1036_v21 = vmul.f32 %v1030_v37, %v987_v6 }
 0x225   : > { %v978_v63 = vadd.f32 %v966_v27, %v904_v45  ;;  %v979_v20 = vadd.f32 %v967_v55, %v2360_v35  ;;  %1173 = vmatpush.msrb.mxu2 %v1102_v19  ;;  %1194 = vmatpush.msrb.mxu3 %v1099_v46  ;;  %v1037_v42 = vmul.f32 %v1027_v61, %v988_v58  ;;  %v1205_v55 = vld.sshfl [vmem:[#allocation1 + $0x18] sm:$0xff pattern:$0x75316420] }
 0x226   : > { %v1080_v16 = vadd.f32 %v1068_v56, %v1056_v60  ;;  %v1081_v34 = vadd.f32 %v1069_v52, %v1057_v26  ;;  %1364 = vmatmul.msk.f32.vlgmr.msrb.gmra.mxu3 %vm1115_vm10, %v2497_v54  ;;  %v1204_v56 = vld.sshfl [vmem:[#allocation1 + $0x10] sm:$0xff pattern:$0x75316420] }
 0x227   : > { %1174 = vmatpush.msrb.mxu2 %v1098_v3 }
 0x228   : > { %v1008_v15 = vpop.permute.xlu1 %1007  ;;  %v1092_v40 = vmax.f32 %v1080_v16, 0.0  ;;  %v1093_v35 = vmax.f32 %v1081_v34, 0.0  ;;  %1363 = vmatmul.msk.f32.vlgmr.msrb.gmra.mxu2 %vm1115_vm10, %v2497_v54  ;;  %v1202_v34 = vld.sshfl [vmem:[#allocation1] sm:$0xff pattern:$0x75316420] }
 0x229   : > { %v932_v43 = vpop.permute.xlu0 %931  ;;  %v1028_v11 = vsel %vm1023_vm9, %v1008_v15, %v2462_v36  ;;  %v1031_v14 = vsel %vm1023_vm9, %v2368_v32, %v1008_v15  ;;  %v1064_v36 = vld [vmem:[#allocation7 + $0x20] sm:$0xff] }
 0x22a   : > { %v953_v5 = vsel %vm949_vm8, %v932_v43, %v2426_v13  ;;  %v956_v31 = vsel %vm949_vm8, %v2362_v10, %v932_v43  ;;  %v1040_v49 = vmul.f32 %v1031_v14, %v991_v8  ;;  %v1041_v44 = vmul.f32 %v1028_v11, %v992_v28  ;;  %v1060_v10 = vld [vmem:[#allocation7] sm:$0xff] }
 0x22b   : > { %v962_v18 = vmul.f32 %v956_v31, %v913_v7  ;;  %v963_v47 = vmul.f32 %v953_v5, %v914_v4  ;;  %v1104_v25 = vmin.f32 %v1092_v40, 6.0  ;;  %v1105_v45 = vmin.f32 %v1093_v35, 6.0 }
 0x22c   : > { %v1052_v12 = vadd.f32 %v1040_v49, %v978_v63  ;;  %v1053_v32 = vadd.f32 %v1041_v44, %v979_v20 }
 0x22d   : > { %v974_v53 = vadd.f32 %v962_v18, %v2415_v29  ;;  %v975_v9 = vadd.f32 %v963_v47, %v901_v17  ;;  %1132 = vmatpush.msrb.mxu0 %v1104_v25  ;;  %1152 = vmatpush.msrb.mxu1 %v1105_v45 }
 0x22e   : > { %v1076_v13 = vadd.f32 %v1064_v36, %v1052_v12  ;;  %v1077_v24 = vadd.f32 %v1065_v2, %v1053_v32 }
 0x22f   : > { %v1048_v48 = vadd.f32 %v1036_v21, %v974_v53  ;;  %v1049_v51 = vadd.f32 %v1037_v42, %v975_v9 }
 0x230   : > { %v1088_v62 = vmax.f32 %v1076_v13, 0.0  ;;  %v1089_v57 = vmax.f32 %v1077_v24, 0.0 }
 0x231   : > { %v1072_v50 = vadd.f32 %v1060_v10, %v1048_v48  ;;  %v1073_v23 = vadd.f32 %v1061_v41, %v1049_v51 }
 0x232   : > { %v1100_v0 = vmin.f32 %v1088_v62, 6.0  ;;  %v1101_v38 = vmin.f32 %v1089_v57, 6.0 }
 0x233   : > { %v1084_v59 = vmax.f32 %v1072_v50, 0.0  ;;  %v1085_v33 = vmax.f32 %v1073_v23, 0.0 }
 0x234   : > { %1133 = vmatpush.msrb.mxu0 %v1100_v0  ;;  %1153 = vmatpush.msrb.mxu1 %v1101_v38 }
 0x235   : > { %v1096_v29 = vmin.f32 %v1084_v59, 6.0  ;;  %v1097_v39 = vmin.f32 %v1085_v33, 6.0 }
 0x237   : > { %1134 = vmatpush.msrb.mxu0 %v1096_v29  ;;  %1154 = vmatpush.msrb.mxu1 %v1097_v39 }
 0x238   : > { %1362 = vmatmul.msk.f32.vlgmr.msrb.gmra.mxu1 %vm1115_vm10, %v2497_v54  ;;  %1361 = vmatmul.msk.f32.vlgmr.msrb.gmra.mxu0 %vm1115_vm10, %v2497_v54 }
 0x283   : > { %v1113_v1 = vpop.permute.xlu0 %1112 }
 0x2a9   : > { %v1196_v27 = vpop.f32.mrf.mxu3 }
 0x2aa   : > { %v1197_v19 = vadd.f32 %v1196_v27, %v1113_v1 }
 0x2ab   : > { %v1176_v46 = vpop.f32.mrf.mxu2 }
 0x2ac   : > { %v1213_v52 = vadd.f32 %v1205_v55, %v1197_v19  ;;  %v1177_v60 = vadd.f32 %v1176_v46, %v1113_v1 }
 0x2ae   : > { %v1219_v26 = vrot.slane %v1213_v52, 4  ;;  %v1212_v63 = vadd.f32 %v1204_v56, %v1177_v60 }
 0x2b0   : > { %v1221_v20 = vsel %vm329_vm0, %v1212_v63, %v1219_v26 }
 0x2b1   : > { %1225 = vst [vmem:[%s302_s15 + $0x8] sm:$0xff] %v1221_v20 }
 0x2b5   : > { %v1156_v3 = vpop.f32.mrf.mxu1  ;;  %v1136_v54 = vpop.f32.mrf.mxu0 }
 0x2b6   : > { %v1157_v22 = vadd.f32 %v1156_v3, %v1113_v1  ;;  %v1137_v16 = vadd.f32 %v1136_v54, %v1113_v1 }
 0x2b8   : > { %v1211_v8 = vadd.f32 %v1203_v30, %v1157_v22  ;;  %v1210_v7 = vadd.f32 %v1202_v34, %v1137_v16 }
 0x2ba   : > { %v1218_v28 = vrot.slane %v1211_v8, 4 }
 0x2bc   : > { %v1220_v4 = vsel %vm329_vm0, %v1210_v7, %v1218_v28 }
 0x2bd   : > { %1224 = vst [vmem:[%s302_s15] sm:$0xff] %v1220_v4 }
 0x2be   : > { %1568 = shalt.err (!%p1565_p9)
}
 0x2bf   : > { %1382 = dma.vmem_to_hbm [thread:$0]  (%p1730_p4), %s1241_s9, 256, %s1243_s10, %s1227_s28  }
 0x2c0 PF: > { %s1254_s26 = sand.u32 1, %s1599_s21   ;;  %p2594_p10 = scmp.ge.s32.totalorder %s1611_s24, 2 }
 0x2c1   : > { %s1255_s14 = scalar_lea.sflag [#allocation4], %s1254_s26 }
 0x2c2   : > { %p1396_p13 = pnand %p2594_p10, %p1734_p6 }
 0x2c4   : > { %p1397_p11 = pneg %p1396_p13 }
 0x2c6   : > { %1594 = dma.done.wait (%p1397_p11), %s1255_s14, 256  }
 0x2c7   : > { %1596 = vsyncadd (%p1397_p11), %s1255_s14, 4294967040  ;;  %p20_p0 = scmp.ge.s32.totalorder %s1704_s16, 4   ;;  %s2595_s21 = smov %s1603_s22 }
 0x2c8   : > { %s2596_s22 = smov %s1607_s23  ;;  %s2597_s23 = smov %s1715_s19 }
 0x2c9   : > { %s2598_s24 = smov %s1704_s16  ;;  %22 = sbr.rel (!%p20_p0) target bundleno = 8 (0x8), region = 107 }
 0x2ce   :  { %1261 = vsyncpa [#allocation3], 1 }
 0x2cf   :  { %1263 = vsyncpa [#allocation3 + $0x1], 1 }
 0x2d0   :  { %1264 = vsyncpa [#allocation6], 1 }
 0x2d1   :  { %1265 = vsyncpa [#allocation4], 1 }
 0x2d2   :  { %1267 = vsyncpa [#allocation4 + $0x1], 1 }

</bundles_post_ra>
